<compile_context>
chip_gen: v7x
topology: tpu7x:2x2x1
jax: 0.10.0
libtpu: 0.0.40
codegen_flags: <defaults>
</compile_context>

<pallas_src>
import math

import jax
import jax.numpy as jnp
from jax import lax
from jax.experimental import pallas as pl
from jax.experimental.pallas import tpu as pltpu

# ----------------------------- configuration --------------------------------
BATCH = 2            # args.batch_size (per device)
C_IN = 4             # input channels
H = W = 16           # spatial
KSIZE, STRIDE, PAD = 3, 2, 1
HO = (H + 2 * PAD - KSIZE) // STRIDE + 1     # 8
WO = (W + 2 * PAD - KSIZE) // STRIDE + 1     # 8
P_SPATIAL = HO * WO                          # 64 patches per image
HP, WP = H + 2 * PAD, W + 2 * PAD            # padded spatial (18, 18)
assert HP % 2 == 0 and WP % 2 == 0
QH, QW = HP // 2, WP // 2                    # parity-decimated spatial (9, 9)
EMBED = 32                                   # backbone embedding
HID = 64                                     # args.mlp = "64-32" -> f = [32, 64, 32]
OUT = 32                                     # num_features
TEMPERATURE = 0.5                            # args.temperature
BN_EPS = 1e-5
NORM_EPS = 1e-12
DIAG = math.exp(1.0 / TEMPERATURE)           # sim-matrix diagonal value


# ------------------------------ fused Pallas kernel --------------------------
def simclr_kernel(x_ref, cw_ref, w1_ref, w2_ref, sm_ref, loss_ref, feats_ref):
    """One grid step: conv + pool for an image tile; last step adds head + loss.

    x_ref:    (2, 2, IMG_TILE, QH, QW, C_IN) parity-decimated padded NHWC tile
    cw_ref:   (9, C_IN, EMBED)  conv weight, tap-major (ki*3 + kj)
    w1_ref:   (EMBED, HID)      projector Linear-1 weight
    w2_ref:   (HID, OUT)        projector Linear-2 weight (no bias)
    sm_ref:   (4, HID)          packed small params:
                                row0[:EMBED]=conv bias, row1=b1, row2=gamma1, row3=beta1
    loss_ref: (1, 1) SMEM       scalar NT-Xent loss (written in last step only)
    feats_ref:(2N, EMBED) VMEM  pooled backbone features (persistent scratch)
    """
    i = pl.program_id(0)
    img_tile = x_ref.shape[2]
    rows = img_tile * P_SPATIAL
    sm = sm_ref[...]

    # ---- backbone stand-in: stride-2 3x3 conv as 9 accumulated MXU matmuls.
    # Tap (ki, kj) reads padded rows 2r+ki, cols 2c+kj -> parity (ki%2, kj%2),
    # decimated window [ki//2 : ki//2+HO) x [kj//2 : kj//2+WO).
    acc = jnp.zeros((rows, EMBED), jnp.float32)
    for ki in range(KSIZE):
        for kj in range(KSIZE):
            tap = x_ref[ki % 2, kj % 2, :,
                        ki // 2:ki // 2 + HO,
                        kj // 2:kj // 2 + WO, :]            # (tile, HO, WO, C)
            tap = tap.reshape(rows, C_IN)
            acc = acc + jnp.dot(tap, cw_ref[ki * KSIZE + kj],
                                preferred_element_type=jnp.float32)
    h = jnp.maximum(acc + sm[0:1, :EMBED], 0.0)             # bias + ReLU
    pooled = jnp.mean(h.reshape(img_tile, P_SPATIAL, EMBED), axis=1)
    off = pl.multiple_of(i * img_tile, img_tile)
    feats_ref[pl.ds(off, img_tile), :] = pooled

    # ---- projector + NT-Xent loss: once, on the last grid step.
    @pl.when(i == pl.num_programs(0) - 1)
    def _():
        feats = feats_ref[...]                              # (2N, EMBED)
        n2 = feats.shape[0]
        b = n2 // 2

        # Linear -> BatchNorm1d (per-view batch stats, biased var) -> ReLU.
        # The two views are contiguous row blocks -> slice, no masks.
        lin = jnp.dot(feats, w1_ref[...],
                      preferred_element_type=jnp.float32) + sm[1:2, :]
        lin_x, lin_y = lin[:b], lin[b:]
        mu_x = jnp.mean(lin_x, axis=0, keepdims=True)
        mu_y = jnp.mean(lin_y, axis=0, keepdims=True)
        dx = lin_x - mu_x
        dy = lin_y - mu_y
        var_x = jnp.mean(dx * dx, axis=0, keepdims=True)
        var_y = jnp.mean(dy * dy, axis=0, keepdims=True)
        g1, beta1 = sm[2:3, :], sm[3:4, :]
        hx = jnp.maximum(dx * lax.rsqrt(var_x + BN_EPS) * g1 + beta1, 0.0)
        hy = jnp.maximum(dy * lax.rsqrt(var_y + BN_EPS) * g1 + beta1, 0.0)
        hidden = jnp.concatenate([hx, hy], axis=0)          # (2N, HID)

        # Linear (no bias) -> F.normalize; 1/sqrt(T) folded into the scale so
        # no /T multiply touches the (2B, 2B) logits below.
        z = jnp.dot(hidden, w2_ref[...], preferred_element_type=jnp.float32)
        sumsq = jnp.sum(z * z, axis=-1, keepdims=True)
        out_s = z * lax.rsqrt(jnp.maximum(sumsq, NORM_EPS * NORM_EPS)
                              * TEMPERATURE)                # (2N, OUT)

        # sim = exp(out @ out.T / T); its diagonal is exp(1/T) because out is
        # L2-normalized (degenerate ||z|| < 1e-12 rows would differ negligibly).
        sim = jnp.exp(lax.dot_general(out_s, out_s, (((1,), (1,)), ((), ())),
                                      preferred_element_type=jnp.float32))
        denom = jnp.sum(sim, axis=-1, keepdims=True) - DIAG  # (2N, 1)

        # -log(pos/denom) = log(denom) - <x, y>/T  (pos never exp'd then log'd)
        pos_logit = jnp.sum(out_s[:b] * out_s[b:], axis=-1, keepdims=True)
        terms = jnp.log(denom[:b]) + jnp.log(denom[b:]) - 2.0 * pos_logit
        loss_ref[0, 0] = jnp.sum(terms) / n2                # mean over 2B terms


# ------------------------------ JAX glue / wrapper ----------------------------
def _rep_spec(shape):
    """Full-array VMEM block, same block for every grid step (loaded once)."""
    zeros = (0,) * len(shape)
    return pl.BlockSpec(shape, lambda i, _z=zeros: _z)


def _pick_img_tile(n2):
    # Images per grid step.  Multiples of 8 keep the pooled-feature scratch
    # store sublane-aligned; tiny batches collapse to a single grid step.
    if n2 < 16:
        return n2
    for t in (64, 32, 16, 8):
        if n2 % t == 0:
            return t
    return n2


@jax.jit
def simclr_forward(params, x, y):
    """SimCLR.forward(x, y) -> scalar NT-Xent loss (one fused Pallas kernel)."""
    # TODO(synk): FullGatherLayer (torch.distributed all_gather) has no
    # single-device Pallas equivalent; with world_size == 1 it is the identity.
    n = x.shape[0]
    n2 = 2 * n
    # Raw NHWC input, zero-padded and parity-decimated (no im2col inflation):
    # xd[ph, pw, :, qh, qw, :] == padded[:, 2*qh + ph, 2*qw + pw, :]
    xy = jnp.concatenate([x, y], axis=0)                        # (2N, C, H, W)
    xy = jnp.transpose(xy, (0, 2, 3, 1))                        # (2N, H, W, C)
    xp = jnp.pad(xy, ((0, 0), (PAD, PAD), (PAD, PAD), (0, 0)))  # (2N, HP, WP, C)
    xd = xp.reshape(n2, QH, 2, QW, 2, C_IN).transpose(2, 4, 0, 1, 3, 5)

    img_tile = _pick_img_tile(n2)
    n_steps = n2 // img_tile

    flops = (2 * n2 * P_SPATIAL * (KSIZE * KSIZE * C_IN) * EMBED
             + 2 * n2 * (EMBED * HID + HID * OUT)
             + 2 * n2 * n2 * OUT)
    bytes_accessed = 4 * (xd.size + params["conv_w"].size + params["w1"].size
                          + params["w2"].size + params["small"].size + 1)

    loss = pl.pallas_call(
        simclr_kernel,
        grid=(n_steps,),
        in_specs=[
            pl.BlockSpec((2, 2, img_tile, QH, QW, C_IN),
                         lambda i: (0, 0, i, 0, 0, 0)),
            _rep_spec((KSIZE * KSIZE, C_IN, EMBED)),
            _rep_spec((EMBED, HID)),
            _rep_spec((HID, OUT)),
            _rep_spec((4, HID)),
        ],
        out_specs=pl.BlockSpec((1, 1), lambda i: (0, 0),
                               memory_space=pltpu.MemorySpace.SMEM),
        out_shape=jax.ShapeDtypeStruct((1, 1), jnp.float32),
        scratch_shapes=[pltpu.VMEM((n2, EMBED), jnp.float32)],
        compiler_params=pltpu.CompilerParams(
            # The epilogue needs all image tiles' features -> sequential axis.
            # TODO(synk): on v7x, a 'parallel' image axis + cross-core (CMEM)
            # feature reduction for the epilogue would use both TensorCores.
            dimension_semantics=("arbitrary",),
            vmem_limit_bytes=32 * 1024 * 1024),
        cost_estimate=pl.CostEstimate(flops=flops,
                                      transcendentals=n2 * n2 + 8 * n2,
                                      bytes_accessed=bytes_accessed),
    )(xd, params["conv_w"], params["w1"], params["w2"], params["small"])
    return loss[0, 0]


def init_params(key):
    ks = jax.random.split(key, 3)
    conv_w = 0.1 * jax.random.normal(ks[0], (KSIZE * KSIZE * C_IN, EMBED),
                                     jnp.float32)
    # packed small params: row0[:EMBED]=conv bias (0), row1=b1 (0),
    # row2=BN gamma (1), row3=BN beta (0)
    small = jnp.zeros((4, HID), jnp.float32).at[2, :].set(1.0)
    return {
        # backbone stand-in: 3x3/stride-2 conv (C_IN -> EMBED), tap-major weights
        "conv_w": conv_w.reshape(KSIZE * KSIZE, C_IN, EMBED),
        "small": small,
        # projector: Linear(EMBED, HID) -> BN(HID) -> ReLU -> Linear(HID, OUT, no bias)
        "w1": 0.1 * jax.random.normal(ks[1], (EMBED, HID), jnp.float32),
        "w2": 0.1 * jax.random.normal(ks[2], (HID, OUT), jnp.float32),
    }


if __name__ == "__main__":
    key = jax.random.PRNGKey(0)
    kp, kx, ky = jax.random.split(key, 3)
    params = init_params(kp)
    # PyTorch-style NCHW inputs (two augmented views)
    x = jax.random.normal(kx, (BATCH, C_IN, H, W), jnp.float32)
    y = jax.random.normal(ky, (BATCH, C_IN, H, W), jnp.float32)

    loss = simclr_forward(params, x, y)
    jax.block_until_ready(loss)
    assert loss.shape == () and bool(jnp.isfinite(loss))
    print("KERNEL_OK")
</pallas_src>

<mosaic_0001>
module attributes {stable_mosaic.version = 11 : i64} {
  func.func @simclr_kernel(%arg0: i32, %arg1: memref<2x2x4x9x9x4xf32, #tpu.memory_space<vmem>>, %arg2: memref<9x4x32xf32, #tpu.memory_space<vmem>>, %arg3: memref<32x64xf32, #tpu.memory_space<vmem>>, %arg4: memref<64x32xf32, #tpu.memory_space<vmem>>, %arg5: memref<4x64xf32, #tpu.memory_space<vmem>>, %arg6: memref<1x1xf32, #tpu.memory_space<smem>>, %arg7: memref<4x32xf32, #tpu.memory_space<vmem>>) attributes {dimension_semantics = [#tpu.dimension_semantics<arbitrary>], iteration_bounds = array<i64: 1>, scalar_prefetch = 0 : i64, scratch_operands = 1 : i64, tpu.core_type = #tpu.core_type<tc>, window_params = [{transform_indices = @transform_0, window_bounds = array<i64: 2, 2, 4, 9, 9, 4>}, {pipeline_mode = #tpu.pipeline_mode<synchronous>, transform_indices = @transform_1, window_bounds = array<i64: 9, 4, 32>}, {pipeline_mode = #tpu.pipeline_mode<synchronous>, transform_indices = @transform_2, window_bounds = array<i64: 32, 64>}, {pipeline_mode = #tpu.pipeline_mode<synchronous>, transform_indices = @transform_3, window_bounds = array<i64: 64, 32>}, {pipeline_mode = #tpu.pipeline_mode<synchronous>, transform_indices = @transform_4, window_bounds = array<i64: 4, 64>}, {transform_indices = @transform_5, window_bounds = array<i64: 1, 1>}]} {
    %c0 = arith.constant 0 : index
    %c0_0 = arith.constant 0 : index
    %0 = vector.load %arg5[%c0, %c0_0] : memref<4x64xf32, #tpu.memory_space<vmem>>, vector<4x64xf32>
    %cst = arith.constant 0.000000e+00 : f32
    %1 = vector.broadcast %cst : f32 to vector<256x32xf32>
    %c0_1 = arith.constant 0 : index
    %c0_2 = arith.constant 0 : index
    %c0_3 = arith.constant 0 : index
    %c0_4 = arith.constant 0 : index
    %c0_5 = arith.constant 0 : index
    %c0_6 = arith.constant 0 : index
    %2 = vector.load %arg1[%c0_1, %c0_2, %c0_3, %c0_4, %c0_5, %c0_6] : memref<2x2x4x9x9x4xf32, #tpu.memory_space<vmem>>, vector<1x1x4x8x8x4xf32>
    %3 = vector.shape_cast %2 : vector<1x1x4x8x8x4xf32> to vector<4x8x8x4xf32>
    %4 = vector.shape_cast %3 : vector<4x8x8x4xf32> to vector<256x4xf32>
    %c0_7 = arith.constant 0 : index
    %c0_8 = arith.constant 0 : index
    %c0_9 = arith.constant 0 : index
    %5 = vector.load %arg2[%c0_7, %c0_8, %c0_9] : memref<9x4x32xf32, #tpu.memory_space<vmem>>, vector<1x4x32xf32>
    %6 = vector.shape_cast %5 : vector<1x4x32xf32> to vector<4x32xf32>
    %cst_10 = arith.constant dense<0.000000e+00> : vector<256x32xf32>
    %7 = tpu.matmul %4, %6, %cst_10 {dimension_numbers = #tpu.dot_dimension_numbers<[1], [0], [0], [1], [0, 0, 1, 1], [], []>} : vector<256x4xf32>, vector<4x32xf32>, vector<256x32xf32> -> vector<256x32xf32>
    %8 = arith.addf %1, %7 : vector<256x32xf32>
    %c0_11 = arith.constant 0 : index
    %c1 = arith.constant 1 : index
    %c0_12 = arith.constant 0 : index
    %c0_13 = arith.constant 0 : index
    %c0_14 = arith.constant 0 : index
    %c0_15 = arith.constant 0 : index
    %9 = vector.load %arg1[%c0_11, %c1, %c0_12, %c0_13, %c0_14, %c0_15] : memref<2x2x4x9x9x4xf32, #tpu.memory_space<vmem>>, vector<1x1x4x8x8x4xf32>
    %10 = vector.shape_cast %9 : vector<1x1x4x8x8x4xf32> to vector<4x8x8x4xf32>
    %11 = vector.shape_cast %10 : vector<4x8x8x4xf32> to vector<256x4xf32>
    %c1_16 = arith.constant 1 : index
    %c0_17 = arith.constant 0 : index
    %c0_18 = arith.constant 0 : index
    %12 = vector.load %arg2[%c1_16, %c0_17, %c0_18] : memref<9x4x32xf32, #tpu.memory_space<vmem>>, vector<1x4x32xf32>
    %13 = vector.shape_cast %12 : vector<1x4x32xf32> to vector<4x32xf32>
    %cst_19 = arith.constant dense<0.000000e+00> : vector<256x32xf32>
    %14 = tpu.matmul %11, %13, %cst_19 {dimension_numbers = #tpu.dot_dimension_numbers<[1], [0], [0], [1], [0, 0, 1, 1], [], []>} : vector<256x4xf32>, vector<4x32xf32>, vector<256x32xf32> -> vector<256x32xf32>
    %15 = arith.addf %8, %14 : vector<256x32xf32>
    %c0_20 = arith.constant 0 : index
    %c0_21 = arith.constant 0 : index
    %c0_22 = arith.constant 0 : index
    %c0_23 = arith.constant 0 : index
    %c1_24 = arith.constant 1 : index
    %c0_25 = arith.constant 0 : index
    %16 = vector.load %arg1[%c0_20, %c0_21, %c0_22, %c0_23, %c1_24, %c0_25] : memref<2x2x4x9x9x4xf32, #tpu.memory_space<vmem>>, vector<1x1x4x8x8x4xf32>
    %17 = vector.shape_cast %16 : vector<1x1x4x8x8x4xf32> to vector<4x8x8x4xf32>
    %18 = vector.shape_cast %17 : vector<4x8x8x4xf32> to vector<256x4xf32>
    %c2 = arith.constant 2 : index
    %c0_26 = arith.constant 0 : index
    %c0_27 = arith.constant 0 : index
    %19 = vector.load %arg2[%c2, %c0_26, %c0_27] : memref<9x4x32xf32, #tpu.memory_space<vmem>>, vector<1x4x32xf32>
    %20 = vector.shape_cast %19 : vector<1x4x32xf32> to vector<4x32xf32>
    %cst_28 = arith.constant dense<0.000000e+00> : vector<256x32xf32>
    %21 = tpu.matmul %18, %20, %cst_28 {dimension_numbers = #tpu.dot_dimension_numbers<[1], [0], [0], [1], [0, 0, 1, 1], [], []>} : vector<256x4xf32>, vector<4x32xf32>, vector<256x32xf32> -> vector<256x32xf32>
    %22 = arith.addf %15, %21 : vector<256x32xf32>
    %c1_29 = arith.constant 1 : index
    %c0_30 = arith.constant 0 : index
    %c0_31 = arith.constant 0 : index
    %c0_32 = arith.constant 0 : index
    %c0_33 = arith.constant 0 : index
    %c0_34 = arith.constant 0 : index
    %23 = vector.load %arg1[%c1_29, %c0_30, %c0_31, %c0_32, %c0_33, %c0_34] : memref<2x2x4x9x9x4xf32, #tpu.memory_space<vmem>>, vector<1x1x4x8x8x4xf32>
    %24 = vector.shape_cast %23 : vector<1x1x4x8x8x4xf32> to vector<4x8x8x4xf32>
    %25 = vector.shape_cast %24 : vector<4x8x8x4xf32> to vector<256x4xf32>
    %c3 = arith.constant 3 : index
    %c0_35 = arith.constant 0 : index
    %c0_36 = arith.constant 0 : index
    %26 = vector.load %arg2[%c3, %c0_35, %c0_36] : memref<9x4x32xf32, #tpu.memory_space<vmem>>, vector<1x4x32xf32>
    %27 = vector.shape_cast %26 : vector<1x4x32xf32> to vector<4x32xf32>
    %cst_37 = arith.constant dense<0.000000e+00> : vector<256x32xf32>
    %28 = tpu.matmul %25, %27, %cst_37 {dimension_numbers = #tpu.dot_dimension_numbers<[1], [0], [0], [1], [0, 0, 1, 1], [], []>} : vector<256x4xf32>, vector<4x32xf32>, vector<256x32xf32> -> vector<256x32xf32>
    %29 = arith.addf %22, %28 : vector<256x32xf32>
    %c1_38 = arith.constant 1 : index
    %c1_39 = arith.constant 1 : index
    %c0_40 = arith.constant 0 : index
    %c0_41 = arith.constant 0 : index
    %c0_42 = arith.constant 0 : index
    %c0_43 = arith.constant 0 : index
    %30 = vector.load %arg1[%c1_38, %c1_39, %c0_40, %c0_41, %c0_42, %c0_43] : memref<2x2x4x9x9x4xf32, #tpu.memory_space<vmem>>, vector<1x1x4x8x8x4xf32>
    %31 = vector.shape_cast %30 : vector<1x1x4x8x8x4xf32> to vector<4x8x8x4xf32>
    %32 = vector.shape_cast %31 : vector<4x8x8x4xf32> to vector<256x4xf32>
    %c4 = arith.constant 4 : index
    %c0_44 = arith.constant 0 : index
    %c0_45 = arith.constant 0 : index
    %33 = vector.load %arg2[%c4, %c0_44, %c0_45] : memref<9x4x32xf32, #tpu.memory_space<vmem>>, vector<1x4x32xf32>
    %34 = vector.shape_cast %33 : vector<1x4x32xf32> to vector<4x32xf32>
    %cst_46 = arith.constant dense<0.000000e+00> : vector<256x32xf32>
    %35 = tpu.matmul %32, %34, %cst_46 {dimension_numbers = #tpu.dot_dimension_numbers<[1], [0], [0], [1], [0, 0, 1, 1], [], []>} : vector<256x4xf32>, vector<4x32xf32>, vector<256x32xf32> -> vector<256x32xf32>
    %36 = arith.addf %29, %35 : vector<256x32xf32>
    %c1_47 = arith.constant 1 : index
    %c0_48 = arith.constant 0 : index
    %c0_49 = arith.constant 0 : index
    %c0_50 = arith.constant 0 : index
    %c1_51 = arith.constant 1 : index
    %c0_52 = arith.constant 0 : index
    %37 = vector.load %arg1[%c1_47, %c0_48, %c0_49, %c0_50, %c1_51, %c0_52] : memref<2x2x4x9x9x4xf32, #tpu.memory_space<vmem>>, vector<1x1x4x8x8x4xf32>
    %38 = vector.shape_cast %37 : vector<1x1x4x8x8x4xf32> to vector<4x8x8x4xf32>
    %39 = vector.shape_cast %38 : vector<4x8x8x4xf32> to vector<256x4xf32>
    %c5 = arith.constant 5 : index
    %c0_53 = arith.constant 0 : index
    %c0_54 = arith.constant 0 : index
    %40 = vector.load %arg2[%c5, %c0_53, %c0_54] : memref<9x4x32xf32, #tpu.memory_space<vmem>>, vector<1x4x32xf32>
    %41 = vector.shape_cast %40 : vector<1x4x32xf32> to vector<4x32xf32>
    %cst_55 = arith.constant dense<0.000000e+00> : vector<256x32xf32>
    %42 = tpu.matmul %39, %41, %cst_55 {dimension_numbers = #tpu.dot_dimension_numbers<[1], [0], [0], [1], [0, 0, 1, 1], [], []>} : vector<256x4xf32>, vector<4x32xf32>, vector<256x32xf32> -> vector<256x32xf32>
    %43 = arith.addf %36, %42 : vector<256x32xf32>
    %c0_56 = arith.constant 0 : index
    %c0_57 = arith.constant 0 : index
    %c0_58 = arith.constant 0 : index
    %c1_59 = arith.constant 1 : index
    %c0_60 = arith.constant 0 : index
    %c0_61 = arith.constant 0 : index
    %44 = vector.load %arg1[%c0_56, %c0_57, %c0_58, %c1_59, %c0_60, %c0_61] : memref<2x2x4x9x9x4xf32, #tpu.memory_space<vmem>>, vector<1x1x4x8x8x4xf32>
    %45 = vector.shape_cast %44 : vector<1x1x4x8x8x4xf32> to vector<4x8x8x4xf32>
    %46 = vector.shape_cast %45 : vector<4x8x8x4xf32> to vector<256x4xf32>
    %c6 = arith.constant 6 : index
    %c0_62 = arith.constant 0 : index
    %c0_63 = arith.constant 0 : index
    %47 = vector.load %arg2[%c6, %c0_62, %c0_63] : memref<9x4x32xf32, #tpu.memory_space<vmem>>, vector<1x4x32xf32>
    %48 = vector.shape_cast %47 : vector<1x4x32xf32> to vector<4x32xf32>
    %cst_64 = arith.constant dense<0.000000e+00> : vector<256x32xf32>
    %49 = tpu.matmul %46, %48, %cst_64 {dimension_numbers = #tpu.dot_dimension_numbers<[1], [0], [0], [1], [0, 0, 1, 1], [], []>} : vector<256x4xf32>, vector<4x32xf32>, vector<256x32xf32> -> vector<256x32xf32>
    %50 = arith.addf %43, %49 : vector<256x32xf32>
    %c0_65 = arith.constant 0 : index
    %c1_66 = arith.constant 1 : index
    %c0_67 = arith.constant 0 : index
    %c1_68 = arith.constant 1 : index
    %c0_69 = arith.constant 0 : index
    %c0_70 = arith.constant 0 : index
    %51 = vector.load %arg1[%c0_65, %c1_66, %c0_67, %c1_68, %c0_69, %c0_70] : memref<2x2x4x9x9x4xf32, #tpu.memory_space<vmem>>, vector<1x1x4x8x8x4xf32>
    %52 = vector.shape_cast %51 : vector<1x1x4x8x8x4xf32> to vector<4x8x8x4xf32>
    %53 = vector.shape_cast %52 : vector<4x8x8x4xf32> to vector<256x4xf32>
    %c7 = arith.constant 7 : index
    %c0_71 = arith.constant 0 : index
    %c0_72 = arith.constant 0 : index
    %54 = vector.load %arg2[%c7, %c0_71, %c0_72] : memref<9x4x32xf32, #tpu.memory_space<vmem>>, vector<1x4x32xf32>
    %55 = vector.shape_cast %54 : vector<1x4x32xf32> to vector<4x32xf32>
    %cst_73 = arith.constant dense<0.000000e+00> : vector<256x32xf32>
    %56 = tpu.matmul %53, %55, %cst_73 {dimension_numbers = #tpu.dot_dimension_numbers<[1], [0], [0], [1], [0, 0, 1, 1], [], []>} : vector<256x4xf32>, vector<4x32xf32>, vector<256x32xf32> -> vector<256x32xf32>
    %57 = arith.addf %50, %56 : vector<256x32xf32>
    %c0_74 = arith.constant 0 : index
    %c0_75 = arith.constant 0 : index
    %c0_76 = arith.constant 0 : index
    %c1_77 = arith.constant 1 : index
    %c1_78 = arith.constant 1 : index
    %c0_79 = arith.constant 0 : index
    %58 = vector.load %arg1[%c0_74, %c0_75, %c0_76, %c1_77, %c1_78, %c0_79] : memref<2x2x4x9x9x4xf32, #tpu.memory_space<vmem>>, vector<1x1x4x8x8x4xf32>
    %59 = vector.shape_cast %58 : vector<1x1x4x8x8x4xf32> to vector<4x8x8x4xf32>
    %60 = vector.shape_cast %59 : vector<4x8x8x4xf32> to vector<256x4xf32>
    %c8 = arith.constant 8 : index
    %c0_80 = arith.constant 0 : index
    %c0_81 = arith.constant 0 : index
    %61 = vector.load %arg2[%c8, %c0_80, %c0_81] : memref<9x4x32xf32, #tpu.memory_space<vmem>>, vector<1x4x32xf32>
    %62 = vector.shape_cast %61 : vector<1x4x32xf32> to vector<4x32xf32>
    %cst_82 = arith.constant dense<0.000000e+00> : vector<256x32xf32>
    %63 = tpu.matmul %60, %62, %cst_82 {dimension_numbers = #tpu.dot_dimension_numbers<[1], [0], [0], [1], [0, 0, 1, 1], [], []>} : vector<256x4xf32>, vector<4x32xf32>, vector<256x32xf32> -> vector<256x32xf32>
    %64 = arith.addf %57, %63 : vector<256x32xf32>
    %65 = vector.extract_strided_slice %0 {offsets = [0, 0], sizes = [1, 32], strides = [1, 1]} : vector<4x64xf32> to vector<1x32xf32>
    %66 = vector.broadcast %65 : vector<1x32xf32> to vector<256x32xf32>
    %67 = arith.addf %64, %66 : vector<256x32xf32>
    %cst_83 = arith.constant 0.000000e+00 : f32
    %68 = vector.broadcast %cst_83 : f32 to vector<256x32xf32>
    %69 = arith.maximumf %67, %68 : vector<256x32xf32>
    %70 = vector.shape_cast %69 : vector<256x32xf32> to vector<4x64x32xf32>
    %cst_84 = arith.constant dense<0.000000e+00> : vector<4x32xf32>
    %71 = vector.multi_reduction <add>, %70, %cst_84 [1] : vector<4x64x32xf32> to vector<4x32xf32>
    %cst_85 = arith.constant 6.400000e+01 : f32
    %72 = vector.broadcast %cst_85 : f32 to vector<4x32xf32>
    %73 = arith.divf %71, %72 : vector<4x32xf32>
    %c4_i32 = arith.constant 4 : i32
    %74 = arith.muli %arg0, %c4_i32 : i32
    %75 = tpu.assume_multiple %74, 4 : i32
    %76 = arith.index_cast %75 : i32 to index
    %c0_86 = arith.constant 0 : index
    %77 = vector.load %arg7[%76, %c0_86] : memref<4x32xf32, #tpu.memory_space<vmem>>, vector<4x32xf32>
    tpu.vector_store %arg7[%76, %c0_86], %73 {strides = array<i32>} : memref<4x32xf32, #tpu.memory_space<vmem>>, vector<4x32xf32>,
    %c0_i32 = arith.constant 0 : i32
    %78 = arith.cmpi eq, %arg0, %c0_i32 : i32
    %79 = arith.extui %78 : i1 to i32
    %c0_i32_87 = arith.constant 0 : i32
    %80 = arith.cmpi ne, %79, %c0_i32_87 : i32
    scf.if %80 {
      %c0_88 = arith.constant 0 : index
      %c0_89 = arith.constant 0 : index
      %81 = vector.load %arg7[%c0_88, %c0_89] : memref<4x32xf32, #tpu.memory_space<vmem>>, vector<4x32xf32>
      %c0_90 = arith.constant 0 : index
      %c0_91 = arith.constant 0 : index
      %82 = vector.load %arg3[%c0_90, %c0_91] : memref<32x64xf32, #tpu.memory_space<vmem>>, vector<32x64xf32>
      %cst_92 = arith.constant dense<0.000000e+00> : vector<4x64xf32>
      %83 = tpu.matmul %81, %82, %cst_92 {dimension_numbers = #tpu.dot_dimension_numbers<[1], [0], [0], [1], [0, 0, 1, 1], [], []>} : vector<4x32xf32>, vector<32x64xf32>, vector<4x64xf32> -> vector<4x64xf32>
      %84 = vector.extract_strided_slice %0 {offsets = [1, 0], sizes = [1, 64], strides = [1, 1]} : vector<4x64xf32> to vector<1x64xf32>
      %85 = vector.broadcast %84 : vector<1x64xf32> to vector<4x64xf32>
      %86 = arith.addf %83, %85 : vector<4x64xf32>
      %87 = vector.extract_strided_slice %86 {offsets = [0, 0], sizes = [2, 64], strides = [1, 1]} : vector<4x64xf32> to vector<2x64xf32>
      %88 = vector.extract_strided_slice %86 {offsets = [2, 0], sizes = [2, 64], strides = [1, 1]} : vector<4x64xf32> to vector<2x64xf32>
      %cst_93 = arith.constant dense<0.000000e+00> : vector<64xf32>
      %89 = vector.multi_reduction <add>, %87, %cst_93 [0] : vector<2x64xf32> to vector<64xf32>
      %90 = vector.shape_cast %89 : vector<64xf32> to vector<1x64xf32>
      %cst_94 = arith.constant 2.000000e+00 : f32
      %91 = vector.broadcast %cst_94 : f32 to vector<1x64xf32>
      %92 = arith.divf %90, %91 : vector<1x64xf32>
      %cst_95 = arith.constant dense<0.000000e+00> : vector<64xf32>
      %93 = vector.multi_reduction <add>, %88, %cst_95 [0] : vector<2x64xf32> to vector<64xf32>
      %94 = vector.shape_cast %93 : vector<64xf32> to vector<1x64xf32>
      %cst_96 = arith.constant 2.000000e+00 : f32
      %95 = vector.broadcast %cst_96 : f32 to vector<1x64xf32>
      %96 = arith.divf %94, %95 : vector<1x64xf32>
      %97 = vector.broadcast %92 : vector<1x64xf32> to vector<2x64xf32>
      %98 = arith.subf %87, %97 : vector<2x64xf32>
      %99 = vector.broadcast %96 : vector<1x64xf32> to vector<2x64xf32>
      %100 = arith.subf %88, %99 : vector<2x64xf32>
      %101 = arith.mulf %98, %98 : vector<2x64xf32>
      %cst_97 = arith.constant dense<0.000000e+00> : vector<64xf32>
      %102 = vector.multi_reduction <add>, %101, %cst_97 [0] : vector<2x64xf32> to vector<64xf32>
      %103 = vector.shape_cast %102 : vector<64xf32> to vector<1x64xf32>
      %cst_98 = arith.constant 2.000000e+00 : f32
      %104 = vector.broadcast %cst_98 : f32 to vector<1x64xf32>
      %105 = arith.divf %103, %104 : vector<1x64xf32>
      %106 = arith.mulf %100, %100 : vector<2x64xf32>
      %cst_99 = arith.constant dense<0.000000e+00> : vector<64xf32>
      %107 = vector.multi_reduction <add>, %106, %cst_99 [0] : vector<2x64xf32> to vector<64xf32>
      %108 = vector.shape_cast %107 : vector<64xf32> to vector<1x64xf32>
      %cst_100 = arith.constant 2.000000e+00 : f32
      %109 = vector.broadcast %cst_100 : f32 to vector<1x64xf32>
      %110 = arith.divf %108, %109 : vector<1x64xf32>
      %111 = vector.extract_strided_slice %0 {offsets = [2, 0], sizes = [1, 64], strides = [1, 1]} : vector<4x64xf32> to vector<1x64xf32>
      %112 = vector.extract_strided_slice %0 {offsets = [3, 0], sizes = [1, 64], strides = [1, 1]} : vector<4x64xf32> to vector<1x64xf32>
      %cst_101 = arith.constant 9.99999974E-6 : f32
      %113 = vector.broadcast %cst_101 : f32 to vector<1x64xf32>
      %114 = arith.addf %105, %113 : vector<1x64xf32>
      %115 = math.rsqrt %114 : vector<1x64xf32>
      %116 = vector.broadcast %115 : vector<1x64xf32> to vector<2x64xf32>
      %117 = arith.mulf %98, %116 : vector<2x64xf32>
      %118 = vector.broadcast %111 : vector<1x64xf32> to vector<2x64xf32>
      %119 = arith.mulf %117, %118 : vector<2x64xf32>
      %120 = vector.broadcast %112 : vector<1x64xf32> to vector<2x64xf32>
      %121 = arith.addf %119, %120 : vector<2x64xf32>
      %cst_102 = arith.constant 0.000000e+00 : f32
      %122 = vector.broadcast %cst_102 : f32 to vector<2x64xf32>
      %123 = arith.maximumf %121, %122 : vector<2x64xf32>
      %cst_103 = arith.constant 9.99999974E-6 : f32
      %124 = vector.broadcast %cst_103 : f32 to vector<1x64xf32>
      %125 = arith.addf %110, %124 : vector<1x64xf32>
      %126 = math.rsqrt %125 : vector<1x64xf32>
      %127 = vector.broadcast %126 : vector<1x64xf32> to vector<2x64xf32>
      %128 = arith.mulf %100, %127 : vector<2x64xf32>
      %129 = vector.broadcast %111 : vector<1x64xf32> to vector<2x64xf32>
      %130 = arith.mulf %128, %129 : vector<2x64xf32>
      %131 = vector.broadcast %112 : vector<1x64xf32> to vector<2x64xf32>
      %132 = arith.addf %130, %131 : vector<2x64xf32>
      %cst_104 = arith.constant 0.000000e+00 : f32
      %133 = vector.broadcast %cst_104 : f32 to vector<2x64xf32>
      %134 = arith.maximumf %132, %133 : vector<2x64xf32>
      %135 = tpu.concatenate %123, %134 in 0 : vector<2x64xf32>, vector<2x64xf32> -> vector<4x64xf32>
      %c0_105 = arith.constant 0 : index
      %c0_106 = arith.constant 0 : index
      %136 = vector.load %arg4[%c0_105, %c0_106] : memref<64x32xf32, #tpu.memory_space<vmem>>, vector<64x32xf32>
      %cst_107 = arith.constant dense<0.000000e+00> : vector<4x32xf32>
      %137 = tpu.matmul %135, %136, %cst_107 {dimension_numbers = #tpu.dot_dimension_numbers<[1], [0], [0], [1], [0, 0, 1, 1], [], []>} : vector<4x64xf32>, vector<64x32xf32>, vector<4x32xf32> -> vector<4x32xf32>
      %138 = arith.mulf %137, %137 : vector<4x32xf32>
      %cst_108 = arith.constant dense<0.000000e+00> : vector<4xf32>
      %139 = vector.multi_reduction <add>, %138, %cst_108 [1] : vector<4x32xf32> to vector<4xf32>
      %140 = vector.shape_cast %139 : vector<4xf32> to vector<4x1xf32>
      %cst_109 = arith.constant 1.000000e-24 : f32
      %141 = vector.broadcast %cst_109 : f32 to vector<4x1xf32>
      %142 = arith.maximumf %140, %141 : vector<4x1xf32>
      %cst_110 = arith.constant 5.000000e-01 : f32
      %143 = vector.broadcast %cst_110 : f32 to vector<4x1xf32>
      %144 = arith.mulf %142, %143 : vector<4x1xf32>
      %145 = math.rsqrt %144 : vector<4x1xf32>
      %146 = vector.broadcast %145 : vector<4x1xf32> to vector<4x32xf32>
      %147 = arith.mulf %137, %146 : vector<4x32xf32>
      %cst_111 = arith.constant dense<0.000000e+00> : vector<4x4xf32>
      %148 = tpu.matmul %147, %147, %cst_111 {dimension_numbers = #tpu.dot_dimension_numbers<[1], [1], [0], [0], [0, 0, 1, 0], [], []>} : vector<4x32xf32>, vector<4x32xf32>, vector<4x4xf32> -> vector<4x4xf32>
      %149 = math.exp %148 : vector<4x4xf32>
      %cst_112 = arith.constant dense<0.000000e+00> : vector<4xf32>
      %150 = vector.multi_reduction <add>, %149, %cst_112 [1] : vector<4x4xf32> to vector<4xf32>
      %151 = vector.shape_cast %150 : vector<4xf32> to vector<4x1xf32>
      %cst_113 = arith.constant 7.3890562 : f32
      %152 = vector.broadcast %cst_113 : f32 to vector<4x1xf32>
      %153 = arith.subf %151, %152 : vector<4x1xf32>
      %154 = vector.extract_strided_slice %147 {offsets = [0, 0], sizes = [2, 32], strides = [1, 1]} : vector<4x32xf32> to vector<2x32xf32>
      %155 = vector.extract_strided_slice %147 {offsets = [2, 0], sizes = [2, 32], strides = [1, 1]} : vector<4x32xf32> to vector<2x32xf32>
      %156 = arith.mulf %154, %155 : vector<2x32xf32>
      %cst_114 = arith.constant dense<0.000000e+00> : vector<2xf32>
      %157 = vector.multi_reduction <add>, %156, %cst_114 [1] : vector<2x32xf32> to vector<2xf32>
      %158 = vector.shape_cast %157 : vector<2xf32> to vector<2x1xf32>
      %159 = vector.extract_strided_slice %153 {offsets = [0, 0], sizes = [2, 1], strides = [1, 1]} : vector<4x1xf32> to vector<2x1xf32>
      %160 = math.log %159 : vector<2x1xf32>
      %161 = vector.extract_strided_slice %153 {offsets = [2, 0], sizes = [2, 1], strides = [1, 1]} : vector<4x1xf32> to vector<2x1xf32>
      %162 = math.log %161 : vector<2x1xf32>
      %163 = arith.addf %160, %162 : vector<2x1xf32>
      %cst_115 = arith.constant 2.000000e+00 : f32
      %164 = vector.broadcast %cst_115 : f32 to vector<2x1xf32>
      %165 = arith.mulf %164, %158 : vector<2x1xf32>
      %166 = arith.subf %163, %165 : vector<2x1xf32>
      %167 = vector.shape_cast %166 : vector<2x1xf32> to vector<1x2x1xf32>
      %cst_116 = arith.constant dense<0.000000e+00> : vector<1xf32>
      %168 = vector.multi_reduction <add>, %167, %cst_116 [1, 2] : vector<1x2x1xf32> to vector<1xf32>
      %169 = vector.shape_cast %168 : vector<1xf32> to vector<1x1x1xf32>
      %170 = vector.extract %169[0, 0, 0] : f32 from vector<1x1x1xf32>
      %cst_117 = arith.constant 4.000000e+00 : f32
      %171 = arith.divf %170, %cst_117 : f32
      %c0_118 = arith.constant 0 : index
      %c0_119 = arith.constant 0 : index
      %172 = memref.load %arg6[%c0_118, %c0_119] : memref<1x1xf32, #tpu.memory_space<smem>>
      memref.store %171, %arg6[%c0_118, %c0_119] : memref<1x1xf32, #tpu.memory_space<smem>>
    } else {
    }
    return
  }
  func.func @transform_0(%arg0: i32) -> (i32, i32, i32, i32, i32, i32) {
    %c0_i32 = arith.constant 0 : i32
    %c0_i32_0 = arith.constant 0 : i32
    %c0_i32_1 = arith.constant 0 : i32
    %c0_i32_2 = arith.constant 0 : i32
    %c0_i32_3 = arith.constant 0 : i32
    %c0_i32_4 = arith.constant 0 : i32
    return %c0_i32, %c0_i32_0, %arg0, %c0_i32_1, %c0_i32_2, %c0_i32_3 : i32, i32, i32, i32, i32, i32
  }
  func.func @transform_1(%arg0: i32) -> (i32, i32, i32) {
    %c0_i32 = arith.constant 0 : i32
    %c0_i32_0 = arith.constant 0 : i32
    %c0_i32_1 = arith.constant 0 : i32
    %c0_i32_2 = arith.constant 0 : i32
    return %c0_i32, %c0_i32_0, %c0_i32_1 : i32, i32, i32
  }
  func.func @transform_2(%arg0: i32) -> (i32, i32) {
    %c0_i32 = arith.constant 0 : i32
    %c0_i32_0 = arith.constant 0 : i32
    %c0_i32_1 = arith.constant 0 : i32
    return %c0_i32, %c0_i32_0 : i32, i32
  }
  func.func @transform_3(%arg0: i32) -> (i32, i32) {
    %c0_i32 = arith.constant 0 : i32
    %c0_i32_0 = arith.constant 0 : i32
    %c0_i32_1 = arith.constant 0 : i32
    return %c0_i32, %c0_i32_0 : i32, i32
  }
  func.func @transform_4(%arg0: i32) -> (i32, i32) {
    %c0_i32 = arith.constant 0 : i32
    %c0_i32_0 = arith.constant 0 : i32
    %c0_i32_1 = arith.constant 0 : i32
    return %c0_i32, %c0_i32_0 : i32, i32
  }
  func.func @transform_5(%arg0: i32) -> (i32, i32) {
    %c0_i32 = arith.constant 0 : i32
    %c0_i32_0 = arith.constant 0 : i32
    %c0_i32_1 = arith.constant 0 : i32
    return %c0_i32, %c0_i32_0 : i32, i32
  }
}

</mosaic_0001>

<bundles_post_ra>
// kernel: simclr_forward.1
= control target key start
LH: loop header
LB: loop body
LE: loop exit
PB: predicated region body
PF: predicated region fallthrough
CT: control target
= control target key end

     0   :  { %vm187_vm0 = vcmask 1043456   ;;  %vm90_vm1 = vcmask 31744   ;;  %s7212_s0 = inlined_call_operand.vmem [shape: f32[2,2,4,9,9,4], index: 0, kind: input, shape index: {}]   ;;  %s7213_s1 = inlined_call_operand.vmem [shape: f32[9,4,32], index: 1, kind: input, shape index: {}]   ;;  %s7214_s2 = inlined_call_operand.vmem [shape: f32[32,64], index: 2, kind: input, shape index: {}]   ;;  %s7215_s3 = inlined_call_operand.vmem [shape: f32[64,32], index: 3, kind: input, shape index: {}]   ;;  %s7216_s4 = inlined_call_operand.vmem [shape: f32[4,64], index: 4, kind: input, shape index: {}]   ;;  %s7217_s5 = inlined_call_operand.hbm [shape: f32[1,1], index: 5, kind: output, shape index: {}]  }
   0x1   :  { %v4045_v0 = vld [vmem:[%s7213_s1 + $0x4] sm:$0xf]  ;;  %v5689_v1 = vld [vmem:[%s7213_s1 + $0x10] sm:$0xf]  ;;  %v4310_v6 = vld [vmem:[%s7213_s1 + $0x14] sm:$0xf] }
   0x2   :  { %v4013_v2 = vld [vmem:[%s7212_s0 + $0x240] sm:$0xff]  ;;  %4860 = vmatprep.subr.msk.mxu1 %vm187_vm0, %v4045_v0  ;;  %5060 = vmatprep.subr.msk.mxu0 %vm187_vm0, %v5689_v1  ;;  %v5703_v4 = vld [vmem:[%s7212_s0 + $0x250] sm:$0xff]  ;;  %v5811_v24 = vld [vmem:[%s7213_s1 + $0x18] sm:$0xf] }
   0x3   :  { %v4212_v3 = vld [vmem:[%s7212_s0 + $0x6c0] sm:$0xff]  ;;  %v4213_v5 = vld [vmem:[%s7212_s0 + $0x6d0] sm:$0xff]  ;;  %4861 = vmatpush3.msk.msra.mxu1 %vm187_vm0, %v4045_v0  ;;  %4862 = vmatprep.mubr.msk.f32.mxu1 %vm90_vm1, %v4013_v2  ;;  %v5893_v39 = vld [vmem:[%s7213_s1 + $0x8] sm:$0xf] }
   0x4   :  { %v5716_v7 = vld [vmem:[%s7212_s0 + $0x260] sm:$0xff]  ;;  %5061 = vmatpush3.msk.msra.mxu0 %vm187_vm0, %v5689_v1  ;;  %5062 = vmatprep.mubr.msk.f32.mxu0 %vm90_vm1, %v4212_v3  ;;  %v5733_v9 = vld [vmem:[%s7212_s0 + $0x270] sm:$0xff]  ;;  %v5982_v56 = vld [vmem:[%s7213_s1 + $0x1c] sm:$0xf] }
   0x5   :  { %v4214_v8 = vld [vmem:[%s7212_s0 + $0x6e0] sm:$0xff]  ;;  %4863 = vmatmul.mubr.msk.f32.vlgmr.msra.gmra.mrb[0].mxu1 %vm90_vm1, %v5703_v4  ;;  %5063 = vmatmul.mubr.msk.f32.vlgmr.msra.gmra.mrb[0].mxu0 %vm90_vm1, %v4213_v5  ;;  %v4215_v10 = vld [vmem:[%s7212_s0 + $0x6f0] sm:$0xff] }
   0x6   :  { %5110 = vmatprep.subr.msk.mxu0 %vm187_vm0, %v4310_v6  ;;  %4865 = vmatprep.mubr.msk.f32.mxu1 %vm90_vm1, %v5716_v7  ;;  %v5743_v11 = vld [vmem:[%s7212_s0 + $0x280] sm:$0xff]  ;;  %v5757_v13 = vld [vmem:[%s7212_s0 + $0x290] sm:$0xff] }
   0x7   :  { %5111 = vmatpush3.msk.msra.mxu0 %vm187_vm0, %v4310_v6  ;;  %5065 = vmatprep.mubr.msk.f32.mxu0 %vm90_vm1, %v4214_v8  ;;  %v4216_v12 = vld [vmem:[%s7212_s0 + $0x700] sm:$0xff]  ;;  %v4217_v14 = vld [vmem:[%s7212_s0 + $0x710] sm:$0xff] }
   0x8   :  { %v5765_v15 = vld [vmem:[%s7212_s0 + $0x2a0] sm:$0xff]  ;;  %v5783_v18 = vld [vmem:[%s7212_s0 + $0x2b0] sm:$0xff]  ;;  %5160 = vmatprep.subr.msk.mxu0 %vm187_vm0, %v5811_v24 }
   0x9   :  { %4866 = vmatmul.mubr.msk.f32.gmra.mrb[2].mxu1 %vm90_vm1, %v5733_v9  ;;  %5066 = vmatmul.mubr.msk.f32.gmra.mrb[2].mxu0 %vm90_vm1, %v4215_v10  ;;  %v4218_v16 = vld [vmem:[%s7212_s0 + $0x720] sm:$0xff]  ;;  %v4219_v19 = vld [vmem:[%s7212_s0 + $0x730] sm:$0xff] }
   0xa   :  { %4868 = vmatprep.mubr.msk.f32.mxu1 %vm90_vm1, %v5743_v11  ;;  %5068 = vmatprep.mubr.msk.f32.mxu0 %vm90_vm1, %v4216_v12  ;;  %v54_v17 = vld [vmem:[%s7213_s1] sm:$0xf]  ;;  %v4021_v20 = vld [vmem:[%s7212_s0 + $0x2d0] sm:$0xff] }
   0xb   :  { %4910 = vmatprep.subr.msk.mxu1 %vm187_vm0, %v54_v17  ;;  %v4220_v21 = vld [vmem:[%s7212_s0 + $0x750] sm:$0xff]  ;;  %v5803_v22 = vld [vmem:[%s7212_s0 + $0x2e0] sm:$0xff] }
   0xc   :  { %4911 = vmatpush3.msk.msra.mxu1 %vm187_vm0, %v54_v17  ;;  %v4221_v23 = vld [vmem:[%s7212_s0 + $0x760] sm:$0xff]  ;;  %v5816_v25 = vld [vmem:[%s7212_s0 + $0x2f0] sm:$0xff] }
   0xd   :  { %4869 = vmatmul.mubr.msk.f32.gmra.mrb[4].mxu1 %vm90_vm1, %v5757_v13  ;;  %5069 = vmatmul.mubr.msk.f32.gmra.mrb[4].mxu0 %vm90_vm1, %v4217_v14  ;;  %v4222_v26 = vld [vmem:[%s7212_s0 + $0x770] sm:$0xff]  ;;  %v5832_v27 = vld [vmem:[%s7212_s0 + $0x300] sm:$0xff] }
   0xe   :  { %4871 = vmatprep.mubr.msk.f32.mxu1 %vm90_vm1, %v5765_v15  ;;  %5071 = vmatprep.mubr.msk.f32.mxu0 %vm90_vm1, %v4218_v16  ;;  %v4223_v28 = vld [vmem:[%s7212_s0 + $0x780] sm:$0xff]  ;;  %v5840_v29 = vld [vmem:[%s7212_s0 + $0x310] sm:$0xff] }
   0xf   :  { %v4224_v30 = vld [vmem:[%s7212_s0 + $0x790] sm:$0xff]  ;;  %v5854_v31 = vld [vmem:[%s7212_s0 + $0x320] sm:$0xff]  ;;  %4960 = vmatprep.subr.msk.mxu1 %vm187_vm0, %v5893_v39 }
  0x10   :  { %v4225_v32 = vld [vmem:[%s7212_s0 + $0x7a0] sm:$0xff]  ;;  %v5862_v33 = vld [vmem:[%s7212_s0 + $0x330] sm:$0xff] }
  0x11   :  { %4872 = vmatmul.mubr.msk.f32.gmra.mrb[6].mxu1 %vm90_vm1, %v5783_v18  ;;  %5072 = vmatmul.mubr.msk.f32.gmra.mrb[6].mxu0 %vm90_vm1, %v4219_v19  ;;  %v4226_v34 = vld [vmem:[%s7212_s0 + $0x7b0] sm:$0xff]  ;;  %v5876_v35 = vld [vmem:[%s7212_s0 + $0x340] sm:$0xff] }
  0x12   :  { %4874 = vmatprep.mubr.msk.f32.mxu1 %vm90_vm1, %v4021_v20  ;;  %5074 = vmatprep.mubr.msk.f32.mxu0 %vm90_vm1, %v4220_v21  ;;  %v4227_v36 = vld [vmem:[%s7212_s0 + $0x7c0] sm:$0xff]  ;;  %v5900_v40 = vld [vmem:[%s7212_s0 + $0x370] sm:$0xff] }
  0x13   :  { %v4029_v37 = vld [vmem:[%s7212_s0 + $0x360] sm:$0xff]  ;;  %v4229_v41 = vld [vmem:[%s7212_s0 + $0x7f0] sm:$0xff] }
  0x14   :  { %v4228_v38 = vld [vmem:[%s7212_s0 + $0x7e0] sm:$0xff]  ;;  %v5924_v44 = vld [vmem:[%s7212_s0 + $0x390] sm:$0xff] }
  0x15   :  { %4875 = vmatmul.mubr.msk.f32.gmra.mrb[8].mxu1 %vm90_vm1, %v5803_v22  ;;  %5075 = vmatmul.mubr.msk.f32.gmra.mrb[8].mxu0 %vm90_vm1, %v4221_v23  ;;  %v5908_v42 = vld [vmem:[%s7212_s0 + $0x380] sm:$0xff]  ;;  %v4231_v45 = vld [vmem:[%s7212_s0 + $0x810] sm:$0xff] }
  0x16   :  { %4877 = vmatprep.mubr.msk.f32.mxu1 %vm90_vm1, %v5816_v25  ;;  %5077 = vmatprep.mubr.msk.f32.mxu0 %vm90_vm1, %v4222_v26  ;;  %v4230_v43 = vld [vmem:[%s7212_s0 + $0x800] sm:$0xff]  ;;  %v5946_v48 = vld [vmem:[%s7212_s0 + $0x3b0] sm:$0xff] }
  0x17   :  { %v5932_v46 = vld [vmem:[%s7212_s0 + $0x3a0] sm:$0xff]  ;;  %v4233_v49 = vld [vmem:[%s7212_s0 + $0x830] sm:$0xff] }
  0x18   :  { %v4232_v47 = vld [vmem:[%s7212_s0 + $0x820] sm:$0xff]  ;;  %v5968_v52 = vld [vmem:[%s7212_s0 + $0x3d0] sm:$0xff] }
  0x19   :  { %4878 = vmatmul.mubr.msk.f32.gmra.mrb[10].mxu1 %vm90_vm1, %v5832_v27  ;;  %5078 = vmatmul.mubr.msk.f32.gmra.mrb[10].mxu0 %vm90_vm1, %v4223_v28  ;;  %v5954_v50 = vld [vmem:[%s7212_s0 + $0x3c0] sm:$0xff]  ;;  %v4279_v53 = vld [vmem:[%s7212_s0 + $0x491] sm:$0xff] }
  0x1a   :  { %4880 = vmatprep.mubr.msk.f32.mxu1 %vm90_vm1, %v5840_v29  ;;  %5080 = vmatprep.mubr.msk.f32.mxu0 %vm90_vm1, %v4224_v30  ;;  %v4278_v51 = vld [vmem:[%s7212_s0 + $0x481] sm:$0xff]  ;;  %v4037_v54 = vld [vmem:[%s7212_s0 + $0x3f0] sm:$0xff] }
  0x1b   :  { %v4280_v55 = vld [vmem:[%s7212_s0 + $0x4a1] sm:$0xff]  ;;  %v4281_v58 = vld [vmem:[%s7212_s0 + $0x4b1] sm:$0xff] }
  0x1c   :  { %v5993_v57 = vld [vmem:[%s7212_s0 + $0x400] sm:$0xff]  ;;  %v6002_v59 = vld [vmem:[%s7212_s0 + $0x410] sm:$0xff] }
  0x1d   :  { %4881 = vmatmul.mubr.msk.f32.gmra.mrb[12].mxu1 %vm90_vm1, %v5854_v31  ;;  %5081 = vmatmul.mubr.msk.f32.gmra.mrb[12].mxu0 %vm90_vm1, %v4225_v32  ;;  %v4282_v60 = vld [vmem:[%s7212_s0 + $0x4c1] sm:$0xff] }
  0x1e   :  { %4883 = vmatprep.mubr.msk.f32.mxu1 %vm90_vm1, %v5862_v33  ;;  %5083 = vmatprep.mubr.msk.f32.mxu0 %vm90_vm1, %v4226_v34 }
  0x21   :  { %4884 = vmatmul.mubr.msk.f32.gmra.mrb[14].mxu1 %vm90_vm1, %v5876_v35  ;;  %5084 = vmatmul.mubr.msk.f32.gmra.mrb[14].mxu0 %vm90_vm1, %v4227_v36 }
  0x22   :  { %4886 = vmatprep.mubr.msk.f32.mxu1 %vm90_vm1, %v4029_v37  ;;  %5086 = vmatprep.mubr.msk.f32.mxu0 %vm90_vm1, %v4228_v38 }
  0x25   :  { %4887 = vmatmul.mubr.msk.f32.gmra.mrb[16].mxu1 %vm90_vm1, %v5900_v40  ;;  %5087 = vmatmul.mubr.msk.f32.gmra.mrb[16].mxu0 %vm90_vm1, %v4229_v41 }
  0x26   :  { %4889 = vmatprep.mubr.msk.f32.mxu1 %vm90_vm1, %v5908_v42  ;;  %5089 = vmatprep.mubr.msk.f32.mxu0 %vm90_vm1, %v4230_v43 }
  0x29   :  { %4890 = vmatmul.mubr.msk.f32.gmra.mrb[18].mxu1 %vm90_vm1, %v5924_v44  ;;  %5090 = vmatmul.mubr.msk.f32.gmra.mrb[18].mxu0 %vm90_vm1, %v4231_v45 }
  0x2a   :  { %4892 = vmatprep.mubr.msk.f32.mxu1 %vm90_vm1, %v5932_v46  ;;  %5092 = vmatprep.mubr.msk.f32.mxu0 %vm90_vm1, %v4232_v47 }
  0x2d   :  { %4893 = vmatmul.mubr.msk.f32.gmra.mrb[20].mxu1 %vm90_vm1, %v5946_v48  ;;  %5093 = vmatmul.mubr.msk.f32.gmra.mrb[20].mxu0 %vm90_vm1, %v4233_v49 }
  0x2e   :  { %4895 = vmatprep.mubr.msk.f32.mxu1 %vm90_vm1, %v5954_v50  ;;  %5112 = vmatprep.mubr.msk.f32.mxu0 %vm90_vm1, %v4278_v51 }
  0x31   :  { %4896 = vmatmul.mubr.msk.f32.gmra.mrb[22].mxu1 %vm90_vm1, %v5968_v52  ;;  %5113 = vmatmul.mubr.msk.f32.vlgmr.msra.gmra.mrb[0].mxu0 %vm90_vm1, %v4279_v53 }
  0x32   :  { %5161 = vmatpush3.msk.msra.mxu0 %vm187_vm0, %v5811_v24  ;;  %4898 = vmatprep.mubr.msk.f32.mxu1 %vm90_vm1, %v4037_v54 }
  0x33   :  { %5115 = vmatprep.mubr.msk.f32.mxu0 %vm90_vm1, %v4280_v55  ;;  %5210 = vmatprep.subr.msk.mxu0 %vm187_vm0, %v5982_v56 }
  0x35   :  { %4899 = vmatmul.mubr.msk.f32.gmra.mrb[24].mxu1 %vm90_vm1, %v5993_v57  ;;  %5116 = vmatmul.mubr.msk.f32.gmra.mrb[2].mxu0 %vm90_vm1, %v4281_v58 }
  0x36   :  { %10 = vsyncpa [#allocation4], 0  ;;  %4901 = vmatprep.mubr.msk.f32.mxu1 %vm90_vm1, %v6002_v59  ;;  %5118 = vmatprep.mubr.msk.f32.mxu0 %vm90_vm1, %v4282_v60  ;;  %v6018_v61 = vld [vmem:[%s7212_s0 + $0x420] sm:$0xff]  ;;  %v4283_v62 = vld [vmem:[%s7212_s0 + $0x4d1] sm:$0xff]  ;;  %vm5650_vm2 = vmmov 0   ;;  %vm3542_vm3 = vcmask 261120  }
  0x37   :  { %v6026_v63 = vld [vmem:[%s7212_s0 + $0x430] sm:$0xff]  ;;  %v4284_v0 = vld [vmem:[%s7212_s0 + $0x4e1] sm:$0xff]  ;;  %v6100_v21 = vld [vmem:[%s7213_s1 + $0xc] sm:$0xf]  ;;  %vm3637_vm4 = vcmask 1041409   ;;  %vm3639_vm5 = vcmask 1042434  }
  0x38   :  { %v6040_v2 = vld [vmem:[%s7212_s0 + $0x440] sm:$0xff]  ;;  %v4285_v3 = vld [vmem:[%s7212_s0 + $0x4f1] sm:$0xff]  ;;  %vm3641_vm6 = vcmask 1043459   ;;  %vm3645_vm7 = vcmask 257024   ;;  %vm3733_vm8 = vcmask 517120   ;;  %vm3797_vm9 = vcmask 1041408  }
  0x39   :  { %4902 = vmatmul.mubr.msk.f32.gmra.mrb[26].mxu1 %vm90_vm1, %v6018_v61  ;;  %5119 = vmatmul.mubr.msk.f32.gmra.mrb[4].mxu0 %vm90_vm1, %v4283_v62  ;;  %v6048_v5 = vld [vmem:[%s7212_s0 + $0x450] sm:$0xff]  ;;  %v6062_v8 = vld [vmem:[%s7212_s0 + $0x460] sm:$0xff]  ;;  %vm3807_vm10 = vcmask 523264   ;;  %vm3972_vm11 = vcmask 254976   ;;  %vm3964_vm12 = vcmask 27648   ;;  %vm3984_vm13 = vcmask 1024  }
  0x3a   :  { %4904 = vmatprep.mubr.msk.f32.mxu1 %vm90_vm1, %v6026_v63  ;;  %5121 = vmatprep.mubr.msk.f32.mxu0 %vm90_vm1, %v4284_v0  ;;  %v4286_v6 = vld [vmem:[%s7212_s0 + $0x511] sm:$0xff]  ;;  %v4287_v10 = vld [vmem:[%s7212_s0 + $0x521] sm:$0xff]  ;;  %s5637_s11 = scalar_lea.hbm %s7217_s5, 16 }
  0x3b   :  { %v22_v12 = vld [vmem:[%s7212_s0] sm:$0xff]  ;;  %v4288_v14 = vld [vmem:[%s7212_s0 + $0x531] sm:$0xff]  ;;  %p5638_p0 = scmp.ne.s32.totalorder %s7217_s5, %s5637_s11  ;;  %p5641_p1 = scmp.lt.u32.totalorder %s5637_s11, %s7217_s5 }
  0x3c   :  { %v6081_v16 = vld [vmem:[%s7212_s0 + $0x10] sm:$0xff]  ;;  %v4289_v17 = vld [vmem:[%s7212_s0 + $0x541] sm:$0xff] }
  0x3d   :  { %4905 = vmatmul.mubr.msk.f32.gmra.mrb[28].mxu1 %vm90_vm1, %v6040_v2  ;;  %5122 = vmatmul.mubr.msk.f32.gmra.mrb[6].mxu0 %vm90_vm1, %v4285_v3  ;;  %v6089_v19 = vld [vmem:[%s7212_s0 + $0x20] sm:$0xff]  ;;  %v4290_v20 = vld [vmem:[%s7212_s0 + $0x551] sm:$0xff]  ;;  %p5643_p2 = pnand %p5641_p1, %p5638_p0 }
  0x3e   :  { %4907 = vmatprep.mubr.msk.f32.mxu1 %vm90_vm1, %v6048_v5  ;;  %5124 = vmatprep.mubr.msk.f32.mxu0 %vm90_vm1, %v4286_v6  ;;  %v6108_v23 = vld [vmem:[%s7212_s0 + $0x30] sm:$0xff]  ;;  %v4291_v24 = vld [vmem:[%s7212_s0 + $0x561] sm:$0xff] }
  0x3f   :  { %v6116_v26 = vld [vmem:[%s7212_s0 + $0x40] sm:$0xff]  ;;  %v4292_v28 = vld [vmem:[%s7212_s0 + $0x571] sm:$0xff] }
  0x40   :  { %v6134_v30 = vld [vmem:[%s7212_s0 + $0x50] sm:$0xff]  ;;  %v4293_v32 = vld [vmem:[%s7212_s0 + $0x581] sm:$0xff] }
  0x41   :  { %4908 = vmatmul.mubr.msk.f32.gmra.mrb[30].mxu1 %vm90_vm1, %v6062_v8  ;;  %5125 = vmatmul.mubr.msk.f32.gmra.mrb[8].mxu0 %vm90_vm1, %v4287_v10  ;;  %v6142_v34 = vld [vmem:[%s7212_s0 + $0x60] sm:$0xff]  ;;  %v6156_v37 = vld [vmem:[%s7212_s0 + $0x70] sm:$0xff] }
  0x42   :  { %4912 = vmatprep.mubr.msk.f32.mxu1 %vm90_vm1, %v22_v12  ;;  %5127 = vmatprep.mubr.msk.f32.mxu0 %vm90_vm1, %v4288_v14  ;;  %v4294_v36 = vld [vmem:[%s7212_s0 + $0x5a1] sm:$0xff]  ;;  %v4295_v38 = vld [vmem:[%s7212_s0 + $0x5b1] sm:$0xff] }
  0x43   :  { %v4296_v41 = vld [vmem:[%s7212_s0 + $0x5c1] sm:$0xff]  ;;  %v4297_v45 = vld [vmem:[%s7212_s0 + $0x5d1] sm:$0xff] }
  0x44   :  { %v6175_v43 = vld [vmem:[%s7212_s0 + $0xa0] sm:$0xff]  ;;  %v6183_v47 = vld [vmem:[%s7212_s0 + $0xb0] sm:$0xff] }
  0x45   :  { %4913 = vmatmul.mubr.msk.f32.vlgmr.msra.gmra.mrb[0].mxu1 %vm90_vm1, %v6081_v16  ;;  %5128 = vmatmul.mubr.msk.f32.gmra.mrb[10].mxu0 %vm90_vm1, %v4289_v17  ;;  %v4298_v49 = vld [vmem:[%s7212_s0 + $0x5e1] sm:$0xff]  ;;  %v4299_v53 = vld [vmem:[%s7212_s0 + $0x5f1] sm:$0xff] }
  0x46   :  { %4915 = vmatprep.mubr.msk.f32.mxu1 %vm90_vm1, %v6089_v19  ;;  %5130 = vmatprep.mubr.msk.f32.mxu0 %vm90_vm1, %v4290_v20  ;;  %v6197_v51 = vld [vmem:[%s7212_s0 + $0xc0] sm:$0xff]  ;;  %v6205_v54 = vld [vmem:[%s7212_s0 + $0xd0] sm:$0xff] }
  0x47   :  { %4961 = vmatpush3.msk.msra.mxu1 %vm187_vm0, %v5893_v39  ;;  %v30_v39 = vld [vmem:[%s7212_s0 + $0x90] sm:$0xff]  ;;  %v4300_v55 = vld [vmem:[%s7212_s0 + $0x601] sm:$0xff] }
  0x48   :  { %5010 = vmatprep.subr.msk.mxu1 %vm187_vm0, %v6100_v21  ;;  %v6219_v58 = vld [vmem:[%s7212_s0 + $0xe0] sm:$0xff]  ;;  %v4301_v60 = vld [vmem:[%s7212_s0 + $0x611] sm:$0xff] }
  0x49   :  { %4916 = vmatmul.mubr.msk.f32.gmra.mrb[2].mxu1 %vm90_vm1, %v6108_v23  ;;  %5131 = vmatmul.mubr.msk.f32.gmra.mrb[12].mxu0 %vm90_vm1, %v4291_v24  ;;  %v6227_v62 = vld [vmem:[%s7212_s0 + $0xf0] sm:$0xff]  ;;  %v6241_v3 = vld [vmem:[%s7212_s0 + $0x100] sm:$0xff] }
  0x4a   :  { %4918 = vmatprep.mubr.msk.f32.mxu1 %vm90_vm1, %v6116_v26  ;;  %5133 = vmatprep.mubr.msk.f32.mxu0 %vm90_vm1, %v4292_v28  ;;  %v4302_v0 = vld [vmem:[%s7212_s0 + $0x631] sm:$0xff]  ;;  %v4303_v6 = vld [vmem:[%s7212_s0 + $0x641] sm:$0xff] }
  0x4b   :  { %v38_v10 = vld [vmem:[%s7212_s0 + $0x120] sm:$0xff]  ;;  %v4304_v12 = vld [vmem:[%s7212_s0 + $0x651] sm:$0xff] }
  0x4c   :  { %v6260_v14 = vld [vmem:[%s7212_s0 + $0x130] sm:$0xff]  ;;  %v4305_v17 = vld [vmem:[%s7212_s0 + $0x661] sm:$0xff] }
  0x4d   :  { %4919 = vmatmul.mubr.msk.f32.gmra.mrb[4].mxu1 %vm90_vm1, %v6134_v30  ;;  %5134 = vmatmul.mubr.msk.f32.gmra.mrb[14].mxu0 %vm90_vm1, %v4293_v32  ;;  %v6268_v20 = vld [vmem:[%s7212_s0 + $0x140] sm:$0xff]  ;;  %v4306_v24 = vld [vmem:[%s7212_s0 + $0x671] sm:$0xff] }
  0x4e   :  { %4921 = vmatprep.mubr.msk.f32.mxu1 %vm90_vm1, %v6142_v34  ;;  %5136 = vmatprep.mubr.msk.f32.mxu0 %vm90_vm1, %v4294_v36  ;;  %v6282_v28 = vld [vmem:[%s7212_s0 + $0x150] sm:$0xff]  ;;  %v4307_v32 = vld [vmem:[%s7212_s0 + $0x681] sm:$0xff] }
  0x4f   :  { %v6290_v36 = vld [vmem:[%s7212_s0 + $0x160] sm:$0xff] }
  0x51   :  { %4922 = vmatmul.mubr.msk.f32.gmra.mrb[6].mxu1 %vm90_vm1, %v6156_v37  ;;  %5137 = vmatmul.mubr.msk.f32.gmra.mrb[16].mxu0 %vm90_vm1, %v4295_v38  ;;  %v4308_v38 = vld [vmem:[%s7212_s0 + $0x691] sm:$0xff] }
  0x52   :  { %4924 = vmatprep.mubr.msk.f32.mxu1 %vm90_vm1, %v30_v39  ;;  %5139 = vmatprep.mubr.msk.f32.mxu0 %vm90_vm1, %v4296_v41  ;;  %v6304_v39 = vld [vmem:[%s7212_s0 + $0x170] sm:$0xff]  ;;  %v4309_v41 = vld [vmem:[%s7212_s0 + $0x6a1] sm:$0xff] }
  0x55   :  { %4925 = vmatmul.mubr.msk.f32.gmra.mrb[8].mxu1 %vm90_vm1, %v6175_v43  ;;  %5140 = vmatmul.mubr.msk.f32.gmra.mrb[18].mxu0 %vm90_vm1, %v4297_v45  ;;  %v6312_v45 = vld [vmem:[%s7212_s0 + $0x180] sm:$0xff] }
  0x56   :  { %4927 = vmatprep.mubr.msk.f32.mxu1 %vm90_vm1, %v6183_v47  ;;  %5142 = vmatprep.mubr.msk.f32.mxu0 %vm90_vm1, %v4298_v49  ;;  %v6324_v49 = vld [vmem:[%s7212_s0 + $0x190] sm:$0xff] }
  0x59   :  { %4928 = vmatmul.mubr.msk.f32.gmra.mrb[10].mxu1 %vm90_vm1, %v6197_v51  ;;  %5143 = vmatmul.mubr.msk.f32.gmra.mrb[20].mxu0 %vm90_vm1, %v4299_v53  ;;  %v46_v53 = vld [vmem:[%s7212_s0 + $0x1b0] sm:$0xff] }
  0x5a   :  { %4930 = vmatprep.mubr.msk.f32.mxu1 %vm90_vm1, %v6205_v54  ;;  %5145 = vmatprep.mubr.msk.f32.mxu0 %vm90_vm1, %v4300_v55  ;;  %v6332_v55 = vld [vmem:[%s7213_s1 + $0x20] sm:$0xf] }
  0x5d   :  { %4931 = vmatmul.mubr.msk.f32.gmra.mrb[12].mxu1 %vm90_vm1, %v6219_v58  ;;  %5146 = vmatmul.mubr.msk.f32.gmra.mrb[22].mxu0 %vm90_vm1, %v4301_v60  ;;  %v6351_v60 = vld [vmem:[%s7212_s0 + $0x1d0] sm:$0xff] }
  0x5e   :  { %4933 = vmatprep.mubr.msk.f32.mxu1 %vm90_vm1, %v6227_v62  ;;  %5148 = vmatprep.mubr.msk.f32.mxu0 %vm90_vm1, %v4302_v0  ;;  %v6424_v0 = vld [vmem:[%s7212_s0 + $0x21] sm:$0xff] }
  0x61   :  { %4934 = vmatmul.mubr.msk.f32.gmra.mrb[14].mxu1 %vm90_vm1, %v6241_v3  ;;  %5149 = vmatmul.mubr.msk.f32.gmra.mrb[24].mxu0 %vm90_vm1, %v4303_v6  ;;  %v6494_v6 = vld [vmem:[%s7212_s0 + $0xa1] sm:$0xff] }
  0x62   :  { %4936 = vmatprep.mubr.msk.f32.mxu1 %vm90_vm1, %v38_v10  ;;  %5151 = vmatprep.mubr.msk.f32.mxu0 %vm90_vm1, %v4304_v12  ;;  %v6499_v10 = vld [vmem:[%s7212_s0 + $0xb1] sm:$0xff]  ;;  %v6512_v12 = vld [vmem:[%s7212_s0 + $0xc1] sm:$0xff] }
  0x65   :  { %4937 = vmatmul.mubr.msk.f32.gmra.mrb[16].mxu1 %vm90_vm1, %v6260_v14  ;;  %5152 = vmatmul.mubr.msk.f32.gmra.mrb[26].mxu0 %vm90_vm1, %v4305_v17  ;;  %v6530_v17 = vld [vmem:[%s7212_s0 + $0xe1] sm:$0xff] }
  0x66   :  { %4939 = vmatprep.mubr.msk.f32.mxu1 %vm90_vm1, %v6268_v20  ;;  %5154 = vmatprep.mubr.msk.f32.mxu0 %vm90_vm1, %v4306_v24  ;;  %v6538_v24 = vld [vmem:[%s7212_s0 + $0xf1] sm:$0xff] }
  0x69   :  { %4940 = vmatmul.mubr.msk.f32.gmra.mrb[18].mxu1 %vm90_vm1, %v6282_v28  ;;  %5155 = vmatmul.mubr.msk.f32.gmra.mrb[28].mxu0 %vm90_vm1, %v4307_v32  ;;  %v756_v32 = vld [vmem:[%s7212_s0 + $0x121] sm:$0xff] }
  0x6a   :  { %4942 = vmatprep.mubr.msk.f32.mxu1 %vm90_vm1, %v6290_v36  ;;  %5157 = vmatprep.mubr.msk.f32.mxu0 %vm90_vm1, %v4308_v38  ;;  %v6570_v38 = vld [vmem:[%s7212_s0 + $0x141] sm:$0xff] }
  0x6d   :  { %4943 = vmatmul.mubr.msk.f32.gmra.mrb[20].mxu1 %vm90_vm1, %v6304_v39  ;;  %5158 = vmatmul.mubr.msk.f32.gmra.mrb[30].mxu0 %vm90_vm1, %v4309_v41  ;;  %v6588_v41 = vld [vmem:[%s7212_s0 + $0x161] sm:$0xff] }
  0x6e   :  { %4945 = vmatprep.mubr.msk.f32.mxu1 %vm90_vm1, %v6312_v45  ;;  %5162 = vmatprep.mubr.msk.f32.mxu0 %vm90_vm1, %v6081_v16  ;;  %v6344_v16 = vld [vmem:[%s7212_s0 + $0x1c0] sm:$0xff] }
  0x71   :  { %4946 = vmatmul.mubr.msk.f32.gmra.mrb[22].mxu1 %vm90_vm1, %v6324_v49  ;;  %5163 = vmatmul.mubr.msk.f32.vlgmr.msra.gmra.mrb[0].mxu0 %vm90_vm1, %v6089_v19  ;;  %v6371_v19 = vld [vmem:[%s7212_s0 + $0x1f0] sm:$0xff] }
  0x72   :  { %5211 = vmatpush3.msk.msra.mxu0 %vm187_vm0, %v5982_v56  ;;  %4948 = vmatprep.mubr.msk.f32.mxu1 %vm90_vm1, %v46_v53  ;;  %v6366_v56 = vld [vmem:[%s7212_s0 + $0x1e0] sm:$0xff] }
  0x73   :  { %5165 = vmatprep.mubr.msk.f32.mxu0 %vm90_vm1, %v6108_v23  ;;  %5260 = vmatprep.subr.msk.mxu0 %vm187_vm0, %v6332_v55  ;;  %v6384_v23 = vld [vmem:[%s7212_s0 + $0x200] sm:$0xff] }
  0x74   :  { %v6609_v53 = vld [vmem:[%s7212_s0 + $0x181] sm:$0xff] }
  0x75   :  { %4949 = vmatmul.mubr.msk.f32.gmra.mrb[24].mxu1 %vm90_vm1, %v6344_v16  ;;  %5166 = vmatmul.mubr.msk.f32.gmra.mrb[2].mxu0 %vm90_vm1, %v6116_v26  ;;  %v4351_v26 = vld [vmem:[%s7212_s0 + $0x80] sm:$0xff] }
  0x76   :  { %4951 = vmatprep.mubr.msk.f32.mxu1 %vm90_vm1, %v6351_v60  ;;  %5168 = vmatprep.mubr.msk.f32.mxu0 %vm90_vm1, %v6134_v30  ;;  %v6392_v30 = vld [vmem:[%s7212_s0 + $0x210] sm:$0xff] }
  0x79   :  { %4952 = vmatmul.mubr.msk.f32.gmra.mrb[26].mxu1 %vm90_vm1, %v6366_v56  ;;  %5169 = vmatmul.mubr.msk.f32.gmra.mrb[4].mxu0 %vm90_vm1, %v6142_v34  ;;  %v6404_v34 = vld [vmem:[%s7212_s0 + $0x220] sm:$0xff] }
  0x7a   :  { %4954 = vmatprep.mubr.msk.f32.mxu1 %vm90_vm1, %v6371_v19  ;;  %5171 = vmatprep.mubr.msk.f32.mxu0 %vm90_vm1, %v6156_v37  ;;  %v740_v37 = vld [vmem:[%s7212_s0 + $0x1] sm:$0xff] }
  0x7d   :  { %4955 = vmatmul.mubr.msk.f32.gmra.mrb[28].mxu1 %vm90_vm1, %v6384_v23  ;;  %5172 = vmatmul.mubr.msk.f32.gmra.mrb[6].mxu0 %vm90_vm1, %v4351_v26  ;;  %v4160_v26 = vld [vmem:[%s7212_s0 + $0x570] sm:$0xff] }
  0x7e   :  { %4957 = vmatprep.mubr.msk.f32.mxu1 %vm90_vm1, %v6392_v30  ;;  %5174 = vmatprep.mubr.msk.f32.mxu0 %vm90_vm1, %v6175_v43  ;;  %v6419_v43 = vld [vmem:[%s7212_s0 + $0x11] sm:$0xff] }
  0x81   :  { %4958 = vmatmul.mubr.msk.f32.gmra.mrb[30].mxu1 %vm90_vm1, %v6404_v34  ;;  %5175 = vmatmul.mubr.msk.f32.gmra.mrb[8].mxu0 %vm90_vm1, %v6183_v47  ;;  %v6437_v47 = vld [vmem:[%s7212_s0 + $0x31] sm:$0xff] }
  0x82   :  { %4962 = vmatprep.mubr.msk.f32.mxu1 %vm90_vm1, %v740_v37  ;;  %5177 = vmatprep.mubr.msk.f32.mxu0 %vm90_vm1, %v6197_v51  ;;  %v6442_v51 = vld [vmem:[%s7212_s0 + $0x41] sm:$0xff] }
  0x83   :  { %v4171_v37 = vld [vmem:[%s7212_s0 + $0x640] sm:$0xff] }
  0x85   :  { %4963 = vmatmul.mubr.msk.f32.vlgmr.msra.gmra.mrb[0].mxu1 %vm90_vm1, %v6419_v43  ;;  %5178 = vmatmul.mubr.msk.f32.gmra.mrb[10].mxu0 %vm90_vm1, %v6205_v54  ;;  %v6459_v54 = vld [vmem:[%s7212_s0 + $0x51] sm:$0xff] }
  0x86   :  { %4965 = vmatprep.mubr.msk.f32.mxu1 %vm90_vm1, %v6424_v0  ;;  %5180 = vmatprep.mubr.msk.f32.mxu0 %vm90_vm1, %v6219_v58  ;;  %v6467_v58 = vld [vmem:[%s7212_s0 + $0x61] sm:$0xff] }
  0x87   :  { %5011 = vmatpush3.msk.msra.mxu1 %vm187_vm0, %v6100_v21  ;;  %v4359_v21 = vld [vmem:[%s7212_s0 + $0x110] sm:$0xff] }
  0x88   :  { %5363 = vmatprep.subr.msk.mxu1 %vm187_vm0, %v5689_v1 }
  0x89   :  { %4966 = vmatmul.mubr.msk.f32.gmra.mrb[2].mxu1 %vm90_vm1, %v6437_v47  ;;  %5181 = vmatmul.mubr.msk.f32.gmra.mrb[12].mxu0 %vm90_vm1, %v6227_v62  ;;  %v6479_v62 = vld [vmem:[%s7212_s0 + $0x71] sm:$0xff] }
  0x8a   :  { %4968 = vmatprep.mubr.msk.f32.mxu1 %vm90_vm1, %v6442_v51  ;;  %5183 = vmatprep.mubr.msk.f32.mxu0 %vm90_vm1, %v6241_v3  ;;  %v748_v3 = vld [vmem:[%s7212_s0 + $0x91] sm:$0xff] }
  0x8d   :  { %4969 = vmatmul.mubr.msk.f32.gmra.mrb[4].mxu1 %vm90_vm1, %v6459_v54  ;;  %5184 = vmatmul.mubr.msk.f32.gmra.mrb[14].mxu0 %vm90_vm1, %v4359_v21  ;;  %v4176_v21 = vld [vmem:[%s7212_s0 + $0x690] sm:$0xff] }
  0x8e   :  { %4971 = vmatprep.mubr.msk.f32.mxu1 %vm90_vm1, %v6467_v58  ;;  %5186 = vmatprep.mubr.msk.f32.mxu0 %vm90_vm1, %v6260_v14  ;;  %v6517_v14 = vld [vmem:[%s7212_s0 + $0xd1] sm:$0xff] }
  0x91   :  { %4972 = vmatmul.mubr.msk.f32.gmra.mrb[6].mxu1 %vm90_vm1, %v6479_v62  ;;  %5187 = vmatmul.mubr.msk.f32.gmra.mrb[16].mxu0 %vm90_vm1, %v6268_v20  ;;  %v4367_v20 = vld [vmem:[%s7212_s0 + $0x1a0] sm:$0xff] }
  0x92   :  { %4974 = vmatprep.mubr.msk.f32.mxu1 %vm90_vm1, %v748_v3  ;;  %5189 = vmatprep.mubr.msk.f32.mxu0 %vm90_vm1, %v6282_v28  ;;  %v6550_v28 = vld [vmem:[%s7212_s0 + $0x101] sm:$0xff]  ;;  %v4235_v3 = vld [vmem:[%s7212_s0 + $0x850] sm:$0xff] }
  0x95   :  { %4975 = vmatmul.mubr.msk.f32.gmra.mrb[8].mxu1 %vm90_vm1, %v6494_v6  ;;  %5190 = vmatmul.mubr.msk.f32.gmra.mrb[18].mxu0 %vm90_vm1, %v6290_v36  ;;  %v6565_v36 = vld [vmem:[%s7212_s0 + $0x131] sm:$0xff] }
  0x96   :  { %4977 = vmatprep.mubr.msk.f32.mxu1 %vm90_vm1, %v6499_v10  ;;  %5192 = vmatprep.mubr.msk.f32.mxu0 %vm90_vm1, %v6304_v39  ;;  %v6583_v39 = vld [vmem:[%s7212_s0 + $0x151] sm:$0xff] }
  0x99   :  { %4978 = vmatmul.mubr.msk.f32.gmra.mrb[10].mxu1 %vm90_vm1, %v6512_v12  ;;  %5193 = vmatmul.mubr.msk.f32.gmra.mrb[20].mxu0 %vm90_vm1, %v6312_v45  ;;  %v6601_v45 = vld [vmem:[%s7212_s0 + $0x171] sm:$0xff] }
  0x9a   :  { %4980 = vmatprep.mubr.msk.f32.mxu1 %vm90_vm1, %v6517_v14  ;;  %5195 = vmatprep.mubr.msk.f32.mxu0 %vm90_vm1, %v6324_v49  ;;  %v4375_v49 = vld [vmem:[%s7212_s0 + $0x230] sm:$0xff] }
  0x9d   :  { %4981 = vmatmul.mubr.msk.f32.gmra.mrb[12].mxu1 %vm90_vm1, %v6530_v17  ;;  %5196 = vmatmul.mubr.msk.f32.gmra.mrb[22].mxu0 %vm90_vm1, %v4367_v20  ;;  %v4240_v20 = vld [vmem:[%s7212_s0 + $0x8b0] sm:$0xff] }
  0x9e   :  { %4983 = vmatprep.mubr.msk.f32.mxu1 %vm90_vm1, %v6538_v24  ;;  %5198 = vmatprep.mubr.msk.f32.mxu0 %vm90_vm1, %v6344_v16  ;;  %v6621_v16 = vld [vmem:[%s7212_s0 + $0x191] sm:$0xff] }
  0xa1   :  { %4984 = vmatmul.mubr.msk.f32.gmra.mrb[14].mxu1 %vm90_vm1, %v6550_v28  ;;  %5199 = vmatmul.mubr.msk.f32.gmra.mrb[24].mxu0 %vm90_vm1, %v6351_v60  ;;  %v764_v60 = vld [vmem:[%s7212_s0 + $0x1b1] sm:$0xff] }
  0xa2   :  { %4986 = vmatprep.mubr.msk.f32.mxu1 %vm90_vm1, %v756_v32  ;;  %5201 = vmatprep.mubr.msk.f32.mxu0 %vm90_vm1, %v6366_v56  ;;  %v6643_v56 = vld [vmem:[%s7212_s0 + $0x1d1] sm:$0xff]  ;;  %v4243_v32 = vld [vmem:[%s7212_s0 + $0x8e0] sm:$0xff] }
  0xa5   :  { %4987 = vmatmul.mubr.msk.f32.gmra.mrb[16].mxu1 %vm90_vm1, %v6565_v36  ;;  %5202 = vmatmul.mubr.msk.f32.gmra.mrb[26].mxu0 %vm90_vm1, %v6371_v19  ;;  %v4148_v19 = vld [vmem:[%s7212_s0 + $0x4a0] sm:$0xff] }
  0xa6   :  { %4989 = vmatprep.mubr.msk.f32.mxu1 %vm90_vm1, %v6570_v38  ;;  %5204 = vmatprep.mubr.msk.f32.mxu0 %vm90_vm1, %v6384_v23  ;;  %v4156_v23 = vld [vmem:[%s7212_s0 + $0x530] sm:$0xff] }
  0xa9   :  { %4990 = vmatmul.mubr.msk.f32.gmra.mrb[18].mxu1 %vm90_vm1, %v6583_v39  ;;  %5205 = vmatmul.mubr.msk.f32.gmra.mrb[28].mxu0 %vm90_vm1, %v6392_v30  ;;  %v4164_v30 = vld [vmem:[%s7212_s0 + $0x5c0] sm:$0xff] }
  0xaa   :  { %4992 = vmatprep.mubr.msk.f32.mxu1 %vm90_vm1, %v6588_v41  ;;  %5207 = vmatprep.mubr.msk.f32.mxu0 %vm90_vm1, %v6404_v34  ;;  %v4168_v34 = vld [vmem:[%s7212_s0 + $0x600] sm:$0xff] }
  0xad   :  { %4993 = vmatmul.mubr.msk.f32.gmra.mrb[20].mxu1 %vm90_vm1, %v6601_v45  ;;  %5208 = vmatmul.mubr.msk.f32.gmra.mrb[30].mxu0 %vm90_vm1, %v4375_v49  ;;  %v3653_v49 = vld [vmem:[%s7214_s2 + $0x8] sm:$0xff] }
  0xae   :  { %4995 = vmatprep.mubr.msk.f32.mxu1 %vm90_vm1, %v6609_v53  ;;  %5212 = vmatprep.mubr.msk.f32.mxu0 %vm90_vm1, %v5703_v4  ;;  %v6636_v4 = vld [vmem:[%s7212_s0 + $0x1c1] sm:$0xff] }
  0xb1   :  { %4996 = vmatmul.mubr.msk.f32.gmra.mrb[22].mxu1 %vm90_vm1, %v6621_v16  ;;  %5213 = vmatmul.mubr.msk.f32.vlgmr.msra.gmra.mrb[0].mxu0 %vm90_vm1, %v5716_v7  ;;  %v6656_v7 = vld [vmem:[%s7212_s0 + $0x1e1] sm:$0xff] }
  0xb2   :  { %5261 = vmatpush3.msk.msra.mxu0 %vm187_vm0, %v6332_v55  ;;  %4998 = vmatprep.mubr.msk.f32.mxu1 %vm90_vm1, %v764_v60  ;;  %v6682_v55 = vld [vmem:[%s7212_s0 + $0x211] sm:$0xff]  ;;  %v5649_v60 = vmov 0.0|0.0  }
  0xb3   :  { %5215 = vmatprep.mubr.msk.f32.mxu0 %vm90_vm1, %v5733_v9  ;;  %v6661_v9 = vld [vmem:[%s7212_s0 + $0x1f1] sm:$0xff] }
  0xb5   :  { %4999 = vmatmul.mubr.msk.f32.gmra.mrb[24].mxu1 %vm90_vm1, %v6636_v4  ;;  %5216 = vmatmul.mubr.msk.f32.gmra.mrb[2].mxu0 %vm90_vm1, %v5743_v11  ;;  %v6674_v11 = vld [vmem:[%s7212_s0 + $0x201] sm:$0xff] }
  0xb6   :  { %5001 = vmatprep.mubr.msk.f32.mxu1 %vm90_vm1, %v6643_v56  ;;  %5218 = vmatprep.mubr.msk.f32.mxu0 %vm90_vm1, %v5757_v13  ;;  %v4417_v13 = vld [vmem:[%s7212_s0 + $0x2c0] sm:$0xff] }
  0xb9   :  { %5002 = vmatmul.mubr.msk.f32.gmra.mrb[26].mxu1 %vm90_vm1, %v6656_v7  ;;  %5219 = vmatmul.mubr.msk.f32.gmra.mrb[4].mxu0 %vm90_vm1, %v5765_v15  ;;  %v6694_v15 = vld [vmem:[%s7212_s0 + $0x221] sm:$0xff] }
  0xba   :  { %5004 = vmatprep.mubr.msk.f32.mxu1 %vm90_vm1, %v6661_v9  ;;  %5221 = vmatprep.mubr.msk.f32.mxu0 %vm90_vm1, %v5783_v18  ;;  %v4146_v18 = vld [vmem:[%s7212_s0 + $0x480] sm:$0xff] }
  0xbd   :  { %5005 = vmatmul.mubr.msk.f32.gmra.mrb[28].mxu1 %vm90_vm1, %v6674_v11  ;;  %5222 = vmatmul.mubr.msk.f32.gmra.mrb[6].mxu0 %vm90_vm1, %v4417_v13 }
  0xbe   :  { %5007 = vmatprep.mubr.msk.f32.mxu1 %vm90_vm1, %v6682_v55  ;;  %5224 = vmatprep.mubr.msk.f32.mxu0 %vm90_vm1, %v5803_v22  ;;  %v4147_v22 = vld [vmem:[%s7212_s0 + $0x490] sm:$0xff] }
  0xc1   :  { %5008 = vmatmul.mubr.msk.f32.gmra.mrb[30].mxu1 %vm90_vm1, %v6694_v15  ;;  %5225 = vmatmul.mubr.msk.f32.gmra.mrb[8].mxu0 %vm90_vm1, %v5816_v25  ;;  %v4149_v25 = vld [vmem:[%s7212_s0 + $0x4b0] sm:$0xff] }
  0xc2   :  { %5012 = vmatprep.mubr.msk.f32.mxu1 %vm90_vm1, %v4146_v18  ;;  %5227 = vmatprep.mubr.msk.f32.mxu0 %vm90_vm1, %v5832_v27  ;;  %v4150_v27 = vld [vmem:[%s7212_s0 + $0x4c0] sm:$0xff] }
  0xc5   :  { %5013 = vmatmul.mubr.msk.f32.vlgmr.msra.gmra.mrb[0].mxu1 %vm90_vm1, %v4147_v22  ;;  %5228 = vmatmul.mubr.msk.f32.gmra.mrb[10].mxu0 %vm90_vm1, %v5840_v29  ;;  %v4151_v29 = vld [vmem:[%s7212_s0 + $0x4d0] sm:$0xff] }
  0xc6   :  { %5015 = vmatprep.mubr.msk.f32.mxu1 %vm90_vm1, %v4148_v19  ;;  %5230 = vmatprep.mubr.msk.f32.mxu0 %vm90_vm1, %v5854_v31  ;;  %v4425_v31 = vld [vmem:[%s7212_s0 + $0x350] sm:$0xff] }
  0xc7   :  { %5364 = vmatpush3.msk.msra.mxu1 %vm187_vm0, %v5689_v1  ;;  %v4152_v1 = vld [vmem:[%s7212_s0 + $0x4e0] sm:$0xff] }
  0xc8   :  { %5345 = vmatprep.subr.bf16.mxu1 %v5649_v60 }
  0xc9   :  { %5016 = vmatmul.mubr.msk.f32.gmra.mrb[2].mxu1 %vm90_vm1, %v4149_v25  ;;  %5231 = vmatmul.mubr.msk.f32.gmra.mrb[12].mxu0 %vm90_vm1, %v5862_v33  ;;  %v4153_v33 = vld [vmem:[%s7212_s0 + $0x4f0] sm:$0xff] }
  0xca   :  { %5018 = vmatprep.mubr.msk.f32.mxu1 %vm90_vm1, %v4150_v27  ;;  %5233 = vmatprep.mubr.msk.f32.mxu0 %vm90_vm1, %v5876_v35  ;;  %v4154_v35 = vld [vmem:[%s7212_s0 + $0x510] sm:$0xff] }
  0xcd   :  { %5019 = vmatmul.mubr.msk.f32.gmra.mrb[4].mxu1 %vm90_vm1, %v4151_v29  ;;  %5234 = vmatmul.mubr.msk.f32.gmra.mrb[14].mxu0 %vm90_vm1, %v4425_v31 }
  0xce   :  { %5021 = vmatprep.mubr.msk.f32.mxu1 %vm90_vm1, %v4152_v1  ;;  %5236 = vmatprep.mubr.msk.f32.mxu0 %vm90_vm1, %v5900_v40  ;;  %v4155_v40 = vld [vmem:[%s7212_s0 + $0x520] sm:$0xff] }
  0xd1   :  { %5022 = vmatmul.mubr.msk.f32.gmra.mrb[6].mxu1 %vm90_vm1, %v4153_v33  ;;  %5237 = vmatmul.mubr.msk.f32.gmra.mrb[16].mxu0 %vm90_vm1, %v5908_v42  ;;  %v4157_v42 = vld [vmem:[%s7212_s0 + $0x540] sm:$0xff] }
  0xd2   :  { %5024 = vmatprep.mubr.msk.f32.mxu1 %vm90_vm1, %v4154_v35  ;;  %5239 = vmatprep.mubr.msk.f32.mxu0 %vm90_vm1, %v5924_v44  ;;  %v4158_v44 = vld [vmem:[%s7212_s0 + $0x550] sm:$0xff]  ;;  %v3474_v35 = vlaneseq }
  0xd5   :  { %5025 = vmatmul.mubr.msk.f32.gmra.mrb[8].mxu1 %vm90_vm1, %v4155_v40  ;;  %5240 = vmatmul.mubr.msk.f32.gmra.mrb[18].mxu0 %vm90_vm1, %v5932_v46  ;;  %v4159_v46 = vld [vmem:[%s7212_s0 + $0x560] sm:$0xff] }
  0xd6   :  { %5027 = vmatprep.mubr.msk.f32.mxu1 %vm90_vm1, %v4156_v23  ;;  %5242 = vmatprep.mubr.msk.f32.mxu0 %vm90_vm1, %v5946_v48  ;;  %v4433_v48 = vld [vmem:[%s7212_s0 + $0x3e0] sm:$0xff] }
  0xd9   :  { %5028 = vmatmul.mubr.msk.f32.gmra.mrb[10].mxu1 %vm90_vm1, %v4157_v42  ;;  %5243 = vmatmul.mubr.msk.f32.gmra.mrb[20].mxu0 %vm90_vm1, %v5954_v50  ;;  %v4161_v50 = vld [vmem:[%s7212_s0 + $0x580] sm:$0xff]  ;;  %v7027_v42 = vshrl.u32 %v3474_v35, 7 }
  0xda   :  { %5030 = vmatprep.mubr.msk.f32.mxu1 %vm90_vm1, %v4158_v44  ;;  %5245 = vmatprep.mubr.msk.f32.mxu0 %vm90_vm1, %v5968_v52  ;;  %v4162_v52 = vld [vmem:[%s7212_s0 + $0x5a0] sm:$0xff] }
  0xdd   :  { %5031 = vmatmul.mubr.msk.f32.gmra.mrb[12].mxu1 %vm90_vm1, %v4159_v46  ;;  %5246 = vmatmul.mubr.msk.f32.gmra.mrb[22].mxu0 %vm90_vm1, %v4433_v48  ;;  %v3476_v48 = vsub.s32 0, %v7027_v42 }
  0xde   :  { %5033 = vmatprep.mubr.msk.f32.mxu1 %vm90_vm1, %v4160_v26  ;;  %5248 = vmatprep.mubr.msk.f32.mxu0 %vm90_vm1, %v5993_v57  ;;  %v4163_v57 = vld [vmem:[%s7212_s0 + $0x5b0] sm:$0xff] }
  0xe1   :  { %5034 = vmatmul.mubr.msk.f32.gmra.mrb[14].mxu1 %vm90_vm1, %v4161_v50  ;;  %5249 = vmatmul.mubr.msk.f32.gmra.mrb[24].mxu0 %vm90_vm1, %v6002_v59  ;;  %v4165_v59 = vld [vmem:[%s7212_s0 + $0x5d0] sm:$0xff]  ;;  %v7039_v50 = vld [vmem:[%s7216_s4] sm:$0xf] }
  0xe2   :  { %5036 = vmatprep.mubr.msk.f32.mxu1 %vm90_vm1, %v4162_v52  ;;  %5251 = vmatprep.mubr.msk.f32.mxu0 %vm90_vm1, %v6018_v61  ;;  %v4166_v61 = vld [vmem:[%s7212_s0 + $0x5e0] sm:$0xff] }
  0xe5   :  { %5037 = vmatmul.mubr.msk.f32.gmra.mrb[16].mxu1 %vm90_vm1, %v4163_v57  ;;  %5252 = vmatmul.mubr.msk.f32.gmra.mrb[26].mxu0 %vm90_vm1, %v6026_v63  ;;  %v4167_v63 = vld [vmem:[%s7212_s0 + $0x5f0] sm:$0xff]  ;;  %v7044_v57 = vrot.slane %v7039_v50, %v3476_v48 }
  0xe6   :  { %5039 = vmatprep.mubr.msk.f32.mxu1 %vm90_vm1, %v4164_v30  ;;  %5254 = vmatprep.mubr.msk.f32.mxu0 %vm90_vm1, %v6040_v2  ;;  %v4441_v2 = vld [vmem:[%s7212_s0 + $0x470] sm:$0xff] }
  0xe9   :  { %5040 = vmatmul.mubr.msk.f32.gmra.mrb[18].mxu1 %vm90_vm1, %v4165_v59  ;;  %5255 = vmatmul.mubr.msk.f32.gmra.mrb[28].mxu0 %vm90_vm1, %v6048_v5  ;;  %v4169_v5 = vld [vmem:[%s7212_s0 + $0x610] sm:$0xff] }
  0xea   :  { %5042 = vmatprep.mubr.msk.f32.mxu1 %vm90_vm1, %v4166_v61  ;;  %5257 = vmatprep.mubr.msk.f32.mxu0 %vm90_vm1, %v6062_v8  ;;  %v4170_v8 = vld [vmem:[%s7212_s0 + $0x630] sm:$0xff] }
  0xed   :  { %5043 = vmatmul.mubr.msk.f32.gmra.mrb[20].mxu1 %vm90_vm1, %v4167_v63  ;;  %5258 = vmatmul.mubr.msk.f32.gmra.mrb[30].mxu0 %vm90_vm1, %v4441_v2 }
  0xee   :  { %5045 = vmatprep.mubr.msk.f32.mxu1 %vm90_vm1, %v4168_v34  ;;  %5262 = vmatprep.mubr.msk.f32.mxu0 %vm90_vm1, %v6419_v43  ;;  %v4172_v43 = vld [vmem:[%s7212_s0 + $0x650] sm:$0xff] }
  0xf1   :  { %5046 = vmatmul.mubr.msk.f32.gmra.mrb[22].mxu1 %vm90_vm1, %v4169_v5  ;;  %5263 = vmatmul.mubr.msk.f32.vlgmr.msra.gmra.mrb[0].mxu0 %vm90_vm1, %v6424_v0  ;;  %v4173_v0 = vld [vmem:[%s7212_s0 + $0x660] sm:$0xff] }
  0xf2   :  { %5048 = vmatprep.mubr.msk.f32.mxu1 %vm90_vm1, %v4170_v8  ;;  %5265 = vmatprep.mubr.msk.f32.mxu0 %vm90_vm1, %v6437_v47  ;;  %v4174_v47 = vld [vmem:[%s7212_s0 + $0x670] sm:$0xff] }
  0xf5   :  { %5049 = vmatmul.mubr.msk.f32.gmra.mrb[24].mxu1 %vm90_vm1, %v4171_v37  ;;  %5266 = vmatmul.mubr.msk.f32.gmra.mrb[2].mxu0 %vm90_vm1, %v6442_v51  ;;  %v4175_v51 = vld [vmem:[%s7212_s0 + $0x680] sm:$0xff] }
  0xf6   :  { %5051 = vmatprep.mubr.msk.f32.mxu1 %vm90_vm1, %v4172_v43  ;;  %5268 = vmatprep.mubr.msk.f32.mxu0 %vm90_vm1, %v6459_v54  ;;  %v4483_v54 = vld [vmem:[%s7212_s0 + $0x81] sm:$0xff] }
  0xf9   :  { %5052 = vmatmul.mubr.msk.f32.gmra.mrb[26].mxu1 %vm90_vm1, %v4173_v0  ;;  %5269 = vmatmul.mubr.msk.f32.gmra.mrb[4].mxu0 %vm90_vm1, %v6467_v58  ;;  %v4177_v58 = vld [vmem:[%s7212_s0 + $0x6a0] sm:$0xff] }
  0xfa   :  { %5054 = vmatprep.mubr.msk.f32.mxu1 %vm90_vm1, %v4174_v47  ;;  %5271 = vmatprep.mubr.msk.f32.mxu0 %vm90_vm1, %v6479_v62  ;;  %v4234_v62 = vld [vmem:[%s7212_s0 + $0x840] sm:$0xff] }
  0xfd   :  { %5055 = vmatmul.mubr.msk.f32.gmra.mrb[28].mxu1 %vm90_vm1, %v4175_v51  ;;  %5272 = vmatmul.mubr.msk.f32.gmra.mrb[6].mxu0 %vm90_vm1, %v4483_v54 }
  0xfe   :  { %5057 = vmatprep.mubr.msk.f32.mxu1 %vm90_vm1, %v4176_v21  ;;  %5274 = vmatprep.mubr.msk.f32.mxu0 %vm90_vm1, %v6494_v6  ;;  %v4236_v6 = vld [vmem:[%s7212_s0 + $0x870] sm:$0xff] }
 0x101   :  { %5058 = vmatmul.mubr.msk.f32.gmra.mrb[30].mxu1 %vm90_vm1, %v4177_v58  ;;  %5275 = vmatmul.mubr.msk.f32.gmra.mrb[8].mxu0 %vm90_vm1, %v6499_v10  ;;  %v4237_v10 = vld [vmem:[%s7212_s0 + $0x880] sm:$0xff] }
 0x102   :  { %5095 = vmatprep.mubr.msk.f32.mxu1 %vm90_vm1, %v4234_v62  ;;  %5277 = vmatprep.mubr.msk.f32.mxu0 %vm90_vm1, %v6512_v12  ;;  %v4238_v12 = vld [vmem:[%s7212_s0 + $0x890] sm:$0xff] }
 0x105   :  { %5096 = vmatmul.mubr.msk.f32.vlgmr.msra.gmra.mrb[22].mxu1 %vm90_vm1, %v4235_v3  ;;  %5278 = vmatmul.mubr.msk.f32.gmra.mrb[10].mxu0 %vm90_vm1, %v6517_v14  ;;  %v4239_v14 = vld [vmem:[%s7212_s0 + $0x8a0] sm:$0xff] }
 0x106   :  { %5098 = vmatprep.mubr.msk.f32.mxu1 %vm90_vm1, %v4236_v6  ;;  %5280 = vmatprep.mubr.msk.f32.mxu0 %vm90_vm1, %v6530_v17  ;;  %v4491_v17 = vld [vmem:[%s7212_s0 + $0x111] sm:$0xff] }
 0x109   :  { %5099 = vmatmul.mubr.msk.f32.gmra.mrb[24].mxu1 %vm90_vm1, %v4237_v10  ;;  %5281 = vmatmul.mubr.msk.f32.gmra.mrb[12].mxu0 %vm90_vm1, %v6538_v24  ;;  %v4241_v24 = vld [vmem:[%s7212_s0 + $0x8c0] sm:$0xff] }
 0x10a   :  { %5101 = vmatprep.mubr.msk.f32.mxu1 %vm90_vm1, %v4238_v12  ;;  %5283 = vmatprep.mubr.msk.f32.mxu0 %vm90_vm1, %v6550_v28  ;;  %v4242_v28 = vld [vmem:[%s7212_s0 + $0x8d0] sm:$0xff] }
 0x10d   :  { %5102 = vmatmul.mubr.msk.f32.gmra.mrb[26].mxu1 %vm90_vm1, %v4239_v14  ;;  %5284 = vmatmul.mubr.msk.f32.gmra.mrb[14].mxu0 %vm90_vm1, %v4491_v17 }
 0x10e   :  { %5104 = vmatprep.mubr.msk.f32.mxu1 %vm90_vm1, %v4240_v20  ;;  %5286 = vmatprep.mubr.msk.f32.mxu0 %vm90_vm1, %v6565_v36  ;;  %v4499_v36 = vld [vmem:[%s7212_s0 + $0x1a1] sm:$0xff] }
 0x111   :  { %5105 = vmatmul.mubr.msk.f32.gmra.mrb[28].mxu1 %vm90_vm1, %v4241_v24  ;;  %5287 = vmatmul.mubr.msk.f32.gmra.mrb[16].mxu0 %vm90_vm1, %v6570_v38  ;;  %v4507_v38 = vld [vmem:[%s7212_s0 + $0x231] sm:$0xff] }
 0x112   :  { %5107 = vmatprep.mubr.msk.f32.mxu1 %vm90_vm1, %v4242_v28  ;;  %5289 = vmatprep.mubr.msk.f32.mxu0 %vm90_vm1, %v6583_v39 }
 0x115   :  { %5108 = vmatmul.mubr.msk.f32.gmra.mrb[30].mxu1 %vm90_vm1, %v4243_v32  ;;  %5290 = vmatmul.mubr.msk.f32.gmra.mrb[18].mxu0 %vm90_vm1, %v6588_v41 }
 0x116   :  { %5292 = vmatprep.mubr.msk.f32.mxu0 %vm90_vm1, %v6601_v45  ;;  %v3652_v45 = vld [vmem:[%s7214_s2] sm:$0xff] }
 0x119   :  { %5293 = vmatmul.mubr.msk.f32.gmra.mrb[20].mxu0 %vm90_vm1, %v6609_v53  ;;  %v5346_v53 = vpack.c.bf16 %v3653_v49, %v3652_v45 }
 0x11a   :  { %5295 = vmatprep.mubr.msk.f32.mxu0 %vm90_vm1, %v6621_v16 }
 0x11b   :  { %5347 = vmatpush3.bf16.msra.mxu1 %v5346_v53 }
 0x11c   :  { %5348 = vmatprep.subr.bf16.mxu1 %v5649_v60 }
 0x11d   :  { %5296 = vmatmul.mubr.msk.f32.gmra.mrb[22].mxu0 %vm90_vm1, %v4499_v36 }
 0x11e   :  { %5298 = vmatprep.mubr.msk.f32.mxu0 %vm90_vm1, %v6636_v4  ;;  %v3654_v4 = vld [vmem:[%s7214_s2 + $0x10] sm:$0xff] }
 0x121   :  { %5299 = vmatmul.mubr.msk.f32.gmra.mrb[24].mxu0 %vm90_vm1, %v6643_v56  ;;  %v3655_v56 = vld [vmem:[%s7214_s2 + $0x18] sm:$0xff] }
 0x122   :  { %5301 = vmatprep.mubr.msk.f32.mxu0 %vm90_vm1, %v6656_v7 }
 0x125   :  { %5302 = vmatmul.mubr.msk.f32.gmra.mrb[26].mxu0 %vm90_vm1, %v6661_v9  ;;  %v5349_v9 = vpack.c.bf16 %v3655_v56, %v3654_v4 }
 0x126   :  { %5304 = vmatprep.mubr.msk.f32.mxu0 %vm90_vm1, %v6674_v11  ;;  %v5651_v11 = vmov 0.0  }
 0x127   :  { %5318 = vmatprep.mubr.msk.f32.mxu1 %vm5650_vm2, %v5651_v11  ;;  %5350 = vmatpush3.bf16.msra.mxu1 %v5349_v9 }
 0x128   :  { %5351 = vmatprep.subr.bf16.mxu1 %v5649_v60 }
 0x129   :  { %5305 = vmatmul.mubr.msk.f32.gmra.mrb[28].mxu0 %vm90_vm1, %v6682_v55 }
 0x12a   :  { %5307 = vmatprep.mubr.msk.f32.mxu0 %vm90_vm1, %v6694_v15 }
 0x12d   :  { %5308 = vmatmul.mubr.msk.f32.gmra.mrb[30].mxu0 %vm90_vm1, %v4507_v38 }
 0x198   :  { %v5014_v39 = vpop.f32.mrb[0].mxu1 }
 0x199   :  { %v1330_v41 = vpop.f32.mrb[1].mxu1 }
 0x19c   :  { %v5017_v16 = vpop.f32.mrb[2].mxu1 }
 0x19d   :  { %v1340_v7 = vpop.f32.mrb[3].mxu1 }
 0x1a0   :  { %v5020_v13 = vpop.f32.mrb[4].mxu1 }
 0x1a1   :  { %v1350_v55 = vpop.f32.mrb[5].mxu1 }
 0x1a4   :  { %v5023_v15 = vpop.f32.mrb[6].mxu1 }
 0x1a5   :  { %v1360_v18 = vpop.f32.mrb[7].mxu1 }
 0x1a8   :  { %v5026_v22 = vpop.f32.mrb[8].mxu1 }
 0x1a9   :  { %v7009_v19 = vpop.f32.mrb[9].mxu1 }
 0x1ac   :  { %v7011_v25 = vpop.f32.mrb[10].mxu1 }
 0x1ad   :  { %v7013_v27 = vpop.f32.mrb[11].mxu1 }
 0x1b0   :  { %v7015_v29 = vpop.f32.mrb[12].mxu1 }
 0x1b1   :  { %v7017_v31 = vpop.f32.mrb[13].mxu1 }
 0x1b4   :  { %v7019_v1 = vpop.f32.mrb[14].mxu1 }
 0x1b5   :  { %v7021_v33 = vpop.f32.mrb[15].mxu1 }
 0x1b8   :  { %v7023_v40 = vpop.f32.mrb[16].mxu1 }
 0x1b9   :  { %v7025_v23 = vpop.f32.mrb[17].mxu1 }
 0x1bc   :  { %v7029_v44 = vpop.f32.mrb[18].mxu1 }
 0x1bd   :  { %v7031_v46 = vpop.f32.mrb[19].mxu1 }
 0x1c0   :  { %v7034_v26 = vpop.f32.mrb[20].mxu1 }
 0x1c1   :  { %v7041_v52 = vpop.f32.mrb[21].mxu1 }
 0x1c4   :  { %v5264_v30 = vpop.f32.mrb[0].mxu0 }
 0x1c5   :  { %v5365_v59 = vadd.f32 %v5264_v30, %v5014_v39  ;;  %v3283_v61 = vpop.f32.mrb[1].mxu0 }
 0x1c6   :  { %v5366_v63 = vadd.f32 %v3283_v61, %v1330_v41 }
 0x1c7   :  { %v3479_v2 = vadd.f32 %v5365_v59, %v7044_v57 }
 0x1c8   :  { %v3478_v34 = vadd.f32 %v5366_v63, %v7044_v57  ;;  %v5267_v5 = vpop.f32.mrb[2].mxu0 }
 0x1c9   :  { %v3511_v8 = vmax.f32 %v3479_v2, 0.0  ;;  %v5367_v37 = vadd.f32 %v5267_v5, %v5017_v16  ;;  %v3293_v43 = vpop.f32.mrb[3].mxu0 }
 0x1ca   :  { %v3510_v0 = vmax.f32 %v3478_v34, 0.0  ;;  %v5368_v47 = vadd.f32 %v3293_v43, %v1340_v7 }
 0x1cb   :  { %v3544_v51 = vsel %vm3542_vm3, %v3511_v8, 0.0  ;;  %v3481_v54 = vadd.f32 %v5367_v37, %v7044_v57 }
 0x1cc   :  { %v3543_v21 = vsel %vm3542_vm3, %v3510_v0, 0.0  ;;  %v3480_v58 = vadd.f32 %v5368_v47, %v7044_v57  ;;  %v5270_v62 = vpop.f32.mrb[4].mxu0 }
 0x1cd   :  { %v3545_v3 = vadd.f32 %v3544_v51, %v3543_v21  ;;  %v5369_v6 = vadd.f32 %v5270_v62, %v5020_v13  ;;  %v3303_v10 = vpop.f32.mrb[5].mxu0  ;;  %v3513_v12 = vmax.f32 %v3481_v54, 0.0 }
 0x1ce   :  { %v3512_v14 = vmax.f32 %v3480_v58, 0.0  ;;  %v5370_v17 = vadd.f32 %v3303_v10, %v1350_v55 }
 0x1cf   :  { %v3483_v20 = vadd.f32 %v5369_v6, %v7044_v57  ;;  %v3548_v41 = vsel %vm3542_vm3, %v3513_v12, 0.0 }
 0x1d0   :  { %v3546_v24 = vsel %vm3542_vm3, %v3512_v14, 0.0  ;;  %v3482_v28 = vadd.f32 %v5370_v17, %v7044_v57  ;;  %v5273_v32 = vpop.f32.mrb[6].mxu0 }
 0x1d1   :  { %v3547_v36 = vadd.f32 %v3546_v24, %v3545_v3  ;;  %v5371_v38 = vadd.f32 %v5273_v32, %v5023_v15  ;;  %v3313_v39 = vpop.f32.mrb[7].mxu0  ;;  %v3515_v45 = vmax.f32 %v3483_v20, 0.0 }
 0x1d2   :  { %v3514_v49 = vmax.f32 %v3482_v28, 0.0  ;;  %v5372_v53 = vadd.f32 %v3313_v39, %v1360_v18 }
 0x1d3   :  { %v3549_v16 = vadd.f32 %v3548_v41, %v3547_v36  ;;  %v3485_v4 = vadd.f32 %v5371_v38, %v7044_v57  ;;  %v3552_v48 = vsel %vm3542_vm3, %v3515_v45, 0.0 }
 0x1d4   :  { %v3550_v56 = vsel %vm3542_vm3, %v3514_v49, 0.0  ;;  %v3484_v7 = vadd.f32 %v5372_v53, %v7044_v57  ;;  %v5276_v9 = vpop.f32.mrb[8].mxu0 }
 0x1d5   :  { %v3551_v13 = vadd.f32 %v3550_v56, %v3549_v16  ;;  %v5373_v55 = vadd.f32 %v5276_v9, %v5026_v22  ;;  %v3323_v35 = vpop.f32.mrb[9].mxu0  ;;  %v3517_v15 = vmax.f32 %v3485_v4, 0.0 }
 0x1d6   :  { %v3516_v30 = vmax.f32 %v3484_v7, 0.0  ;;  %v5374_v59 = vadd.f32 %v3323_v35, %v7009_v19 }
 0x1d7   :  { %v3553_v61 = vadd.f32 %v3552_v48, %v3551_v13  ;;  %v3487_v18 = vadd.f32 %v5373_v55, %v7044_v57  ;;  %v3556_v47 = vsel %vm3542_vm3, %v3517_v15, 0.0 }
 0x1d8   :  { %v3554_v63 = vsel %vm3542_vm3, %v3516_v30, 0.0  ;;  %v3486_v2 = vadd.f32 %v5374_v59, %v7044_v57  ;;  %v7064_v34 = vpop.f32.mrb[22].mxu1  ;;  %v5279_v5 = vpop.f32.mrb[10].mxu0 }
 0x1d9   :  { %v3555_v8 = vadd.f32 %v3554_v63, %v3553_v61  ;;  %v3519_v37 = vmax.f32 %v3487_v18, 0.0  ;;  %v5375_v22 = vadd.f32 %v5279_v5, %v7011_v25  ;;  %v7067_v43 = vpop.f32.mrb[23].mxu1  ;;  %v3333_v0 = vpop.f32.mrb[11].mxu0 }
 0x1da   :  { %v3518_v19 = vmax.f32 %v3486_v2, 0.0  ;;  %v5376_v51 = vadd.f32 %v3333_v0, %v7013_v27 }
 0x1db   :  { %v3557_v54 = vadd.f32 %v3556_v47, %v3555_v8  ;;  %v3565_v21 = vsel %vm3542_vm3, %v3519_v37, 0.0  ;;  %v3489_v58 = vadd.f32 %v5375_v22, %v7044_v57 }
 0x1dc   :  { %v3564_v62 = vsel %vm3542_vm3, %v3518_v19, 0.0  ;;  %v3488_v3 = vadd.f32 %v5376_v51, %v7044_v57  ;;  %v7075_v6 = vpop.f32.mrb[24].mxu1  ;;  %v5282_v25 = vpop.f32.mrb[12].mxu0 }
 0x1dd   :  { %v3566_v10 = vadd.f32 %v3565_v21, %v3564_v62  ;;  %v5377_v12 = vadd.f32 %v5282_v25, %v7015_v29  ;;  %v7078_v14 = vpop.f32.mrb[25].mxu1  ;;  %v3343_v17 = vpop.f32.mrb[13].mxu0  ;;  %v3521_v20 = vmax.f32 %v3489_v58, 0.0  ;;  %v3558_v32 = vrot.slane %v3557_v54, 4 }
 0x1de   :  { %v3520_v27 = vmax.f32 %v3488_v3, 0.0  ;;  %v5378_v24 = vadd.f32 %v3343_v17, %v7017_v31 }
 0x1df   :  { %v3491_v28 = vadd.f32 %v5377_v12, %v7044_v57  ;;  %v3569_v16 = vsel %vm3542_vm3, %v3521_v20, 0.0  ;;  %v3559_v13 = vadd.f32 %v3558_v32, %v3557_v54 }
 0x1e0   :  { %v3567_v36 = vsel %vm3542_vm3, %v3520_v27, 0.0  ;;  %v3490_v38 = vadd.f32 %v5378_v24, %v7044_v57  ;;  %v7084_v39 = vpop.f32.mrb[26].mxu1  ;;  %v5285_v41 = vpop.f32.mrb[14].mxu0 }
 0x1e1   :  { %v3568_v45 = vadd.f32 %v3567_v36, %v3566_v10  ;;  %v5379_v29 = vadd.f32 %v5285_v41, %v7019_v1  ;;  %v7087_v49 = vpop.f32.mrb[27].mxu1  ;;  %v3353_v53 = vpop.f32.mrb[15].mxu0  ;;  %v3523_v4 = vmax.f32 %v3491_v28, 0.0  ;;  %v3560_v37 = vrot.slane %v3559_v13, 2 }
 0x1e2   :  { %v3522_v31 = vmax.f32 %v3490_v38, 0.0  ;;  %v5380_v56 = vadd.f32 %v3353_v53, %v7021_v33 }
 0x1e3   :  { %v3570_v7 = vadd.f32 %v3569_v16, %v3568_v45  ;;  %v3493_v9 = vadd.f32 %v5379_v29, %v7044_v57  ;;  %v3573_v18 = vsel %vm3542_vm3, %v3523_v4, 0.0  ;;  %v3561_v17 = vadd.f32 %v3560_v37, %v3559_v13 }
 0x1e4   :  { %v3571_v55 = vsel %vm3542_vm3, %v3522_v31, 0.0  ;;  %v3492_v35 = vadd.f32 %v5380_v56, %v7044_v57  ;;  %v7094_v48 = vpop.f32.mrb[28].mxu1  ;;  %v5288_v1 = vpop.f32.mrb[16].mxu0 }
 0x1e5   :  { %v3572_v15 = vadd.f32 %v3571_v55, %v3570_v7  ;;  %v5381_v30 = vadd.f32 %v5288_v1, %v7023_v40  ;;  %v7097_v59 = vpop.f32.mrb[29].mxu1  ;;  %v3363_v61 = vpop.f32.mrb[17].mxu0  ;;  %v3525_v33 = vmax.f32 %v3493_v9, 0.0  ;;  %v3562_v53 = vrot.slane %v3561_v17, 1 }
 0x1e6   :  { %v3524_v63 = vmax.f32 %v3492_v35, 0.0  ;;  %v5382_v2 = vadd.f32 %v3363_v61, %v7025_v23 }
 0x1e7   :  { %v3574_v5 = vadd.f32 %v3573_v18, %v3572_v15  ;;  %v3495_v8 = vadd.f32 %v5381_v30, %v7044_v57  ;;  %v3577_v23 = vsel %vm3542_vm3, %v3525_v33, 0.0  ;;  %v3563_v61 = vadd.f32 %v3562_v53, %v3561_v17 }
 0x1e8   :  { %v3575_v22 = vsel %vm3542_vm3, %v3524_v63, 0.0  ;;  %v3494_v0 = vadd.f32 %v5382_v2, %v7044_v57  ;;  %v7104_v47 = vpop.f32.mrb[30].mxu1  ;;  %v5291_v40 = vpop.f32.mrb[18].mxu0 }
 0x1e9   :  { %v3576_v19 = vadd.f32 %v3575_v22, %v3574_v5  ;;  %v3527_v51 = vmax.f32 %v3495_v8, 0.0  ;;  %v5383_v54 = vadd.f32 %v5291_v40, %v7029_v44  ;;  %v7107_v21 = vpop.f32.mrb[31].mxu1  ;;  %v3373_v58 = vpop.f32.mrb[19].mxu0 }
 0x1ea   :  { %v3526_v62 = vmax.f32 %v3494_v0, 0.0  ;;  %v5384_v3 = vadd.f32 %v3373_v58, %v7031_v46 }
 0x1eb   :  { %v3578_v25 = vadd.f32 %v3577_v23, %v3576_v19  ;;  %v3586_v10 = vsel %vm3542_vm3, %v3527_v51, 0.0  ;;  %v3497_v12 = vadd.f32 %v5383_v54, %v7044_v57  ;;  %v3628_v54 = vmul.f32 0.015625, %v3563_v61 }
 0x1ec   :  { %v3585_v20 = vsel %vm3542_vm3, %v3526_v62, 0.0  ;;  %v3496_v27 = vadd.f32 %v5384_v3, %v7044_v57  ;;  %v5294_v24 = vpop.f32.mrb[20].mxu0 }
 0x1ed   :  { %v3579_v44 = vrot.slane %v3578_v25, 4  ;;  %v3587_v28 = vadd.f32 %v3586_v10, %v3585_v20  ;;  %v5385_v32 = vadd.f32 %v5294_v24, %v7034_v26  ;;  %v3383_v36 = vpop.f32.mrb[21].mxu0  ;;  %v3529_v38 = vmax.f32 %v3497_v12, 0.0 }
 0x1ee   :  { %v3528_v41 = vmax.f32 %v3496_v27, 0.0  ;;  %v5386_v46 = vadd.f32 %v3383_v36, %v7041_v52 }
 0x1ef   :  { %v3580_v45 = vadd.f32 %v3579_v44, %v3578_v25  ;;  %v3499_v29 = vadd.f32 %v5385_v32, %v7044_v57  ;;  %v3590_v26 = vsel %vm3542_vm3, %v3529_v38, 0.0 }
 0x1f0   :  { %v3588_v16 = vsel %vm3542_vm3, %v3528_v41, 0.0  ;;  %v3498_v4 = vadd.f32 %v5386_v46, %v7044_v57  ;;  %v5297_v31 = vpop.f32.mrb[22].mxu0 }
 0x1f1   :  { %v3581_v56 = vrot.slane %v3580_v45, 2  ;;  %v3589_v7 = vadd.f32 %v3588_v16, %v3587_v28  ;;  %v5387_v9 = vadd.f32 %v5297_v31, %v7064_v34  ;;  %v3393_v13 = vpop.f32.mrb[23].mxu0  ;;  %v3531_v55 = vmax.f32 %v3499_v29, 0.0 }
 0x1f2   :  { %v3530_v35 = vmax.f32 %v3498_v4, 0.0  ;;  %v5388_v52 = vadd.f32 %v3393_v13, %v7067_v43 }
 0x1f3   :  { %v3582_v1 = vadd.f32 %v3581_v56, %v3580_v45  ;;  %v3591_v15 = vadd.f32 %v3590_v26, %v3589_v7  ;;  %v3501_v30 = vadd.f32 %v5387_v9, %v7044_v57  ;;  %v3594_v37 = vsel %vm3542_vm3, %v3531_v55, 0.0 }
 0x1f4   :  { %v3592_v18 = vsel %vm3542_vm3, %v3530_v35, 0.0  ;;  %v3500_v33 = vadd.f32 %v5388_v52, %v7044_v57  ;;  %v5300_v63 = vpop.f32.mrb[24].mxu0 }
 0x1f5   :  { %v3583_v2 = vrot.slane %v3582_v1, 1  ;;  %v3593_v5 = vadd.f32 %v3592_v18, %v3591_v15  ;;  %v5389_v34 = vadd.f32 %v5300_v63, %v7075_v6  ;;  %v3403_v8 = vpop.f32.mrb[25].mxu0  ;;  %v3533_v22 = vmax.f32 %v3501_v30, 0.0 }
 0x1f6   :  { %v3532_v0 = vmax.f32 %v3500_v33, 0.0  ;;  %v5390_v43 = vadd.f32 %v3403_v8, %v7078_v14 }
 0x1f7   :  { %v3584_v40 = vadd.f32 %v3583_v2, %v3582_v1  ;;  %v3595_v19 = vadd.f32 %v3594_v37, %v3593_v5  ;;  %v3503_v51 = vadd.f32 %v5389_v34, %v7044_v57  ;;  %v3598_v17 = vsel %vm3542_vm3, %v3533_v22, 0.0 }
 0x1f8   :  { %v3596_v58 = vsel %vm3542_vm3, %v3532_v0, 0.0  ;;  %v3502_v23 = vadd.f32 %v5390_v43, %v7044_v57  ;;  %v5303_v62 = vpop.f32.mrb[26].mxu0 }
 0x1f9   :  { %v3629_v3 = vmul.f32 0.015625, %v3584_v40  ;;  %v3597_v6 = vadd.f32 %v3596_v58, %v3595_v19  ;;  %v3535_v25 = vmax.f32 %v3503_v51, 0.0  ;;  %v5391_v10 = vadd.f32 %v5303_v62, %v7084_v39  ;;  %v3413_v12 = vpop.f32.mrb[27].mxu0 }
 0x1fa   :  { %v3534_v14 = vmax.f32 %v3502_v23, 0.0  ;;  %v5392_v20 = vadd.f32 %v3413_v12, %v7087_v49 }
 0x1fb   :  { %v3638_v27 = vsel %vm3637_vm4, %v3629_v3, %v3628_v54  ;;  %v3599_v24 = vadd.f32 %v3598_v17, %v3597_v6  ;;  %v3607_v44 = vsel %vm3542_vm3, %v3535_v25, 0.0  ;;  %v3505_v28 = vadd.f32 %v5391_v10, %v7044_v57  ;;  %v3799_v25 = vld [vmem:[%s7215_s3] sm:$0xff]  ;;  %v3800_v10 = vld [vmem:[%s7215_s3 + $0x8] sm:$0xff]  ;;  %v3801_v17 = vld [vmem:[%s7215_s3 + $0x10] sm:$0xff] }
 0x1fc   :  { %v3606_v32 = vsel %vm3542_vm3, %v3534_v14, 0.0  ;;  %v3504_v36 = vadd.f32 %v5392_v20, %v7044_v57  ;;  %v5306_v38 = vpop.f32.mrb[28].mxu0  ;;  %v5352_v12 = vpack.c.bf16 %v3800_v10, %v3799_v25  ;;  %v3802_v14 = vld [vmem:[%s7215_s3 + $0x18] sm:$0xff] }
 0x1fd   :  { %v3600_v41 = vrot.slane %v3599_v24, 4  ;;  %v3608_v46 = vadd.f32 %v3607_v44, %v3606_v32  ;;  %v5393_v39 = vadd.f32 %v5306_v38, %v7094_v48  ;;  %v3423_v45 = vpop.f32.mrb[29].mxu0  ;;  %v3537_v29 = vmax.f32 %v3505_v28, 0.0  ;;  %v3805_v28 = vld [vmem:[%s7215_s3 + $0x30] sm:$0xff]  ;;  %v3806_v32 = vld [vmem:[%s7215_s3 + $0x38] sm:$0xff] }
 0x1fe   :  { %v3536_v53 = vmax.f32 %v3504_v36, 0.0  ;;  %v5394_v49 = vadd.f32 %v3423_v45, %v7097_v59  ;;  %v5355_v20 = vpack.c.bf16 %v3802_v14, %v3801_v17  ;;  %v5361_v36 = vpack.c.bf16 %v3806_v32, %v3805_v28 }
 0x1ff   :  { %v3601_v16 = vadd.f32 %v3600_v41, %v3599_v24  ;;  %v3507_v4 = vadd.f32 %v5393_v39, %v7044_v57  ;;  %v3611_v48 = vsel %vm3542_vm3, %v3537_v29, 0.0  ;;  %v3804_v24 = vld [vmem:[%s7215_s3 + $0x28] sm:$0xff]  ;;  %v3658_v38 = vsub.s32 1, %v7027_v42 }
 0x200   :  { %v3609_v31 = vsel %vm3542_vm3, %v3536_v53, 0.0  ;;  %v3506_v56 = vadd.f32 %v5394_v49, %v7044_v57  ;;  %v5309_v7 = vpop.f32.mrb[30].mxu0 }
 0x201   :  { %v3602_v9 = vrot.slane %v3601_v16, 2  ;;  %v3610_v13 = vadd.f32 %v3609_v31, %v3608_v46  ;;  %v5395_v26 = vadd.f32 %v5309_v7, %v7104_v47  ;;  %v3433_v55 = vpop.f32.mrb[31].mxu0  ;;  %v3539_v35 = vmax.f32 %v3507_v4, 0.0 }
 0x202   :  { %v3538_v52 = vmax.f32 %v3506_v56, 0.0  ;;  %v5396_v1 = vadd.f32 %v3433_v55, %v7107_v21  ;;  %v3659_v41 = vrot.slane %v7039_v50, %v3658_v38 }
 0x203   :  { %v3603_v59 = vadd.f32 %v3602_v9, %v3601_v16  ;;  %v3612_v15 = vadd.f32 %v3611_v48, %v3610_v13  ;;  %v3509_v30 = vadd.f32 %v5395_v26, %v7044_v57  ;;  %v3615_v2 = vsel %vm3542_vm3, %v3539_v35, 0.0 }
 0x204   :  { %v3613_v61 = vsel %vm3542_vm3, %v3538_v52, 0.0  ;;  %v3508_v18 = vadd.f32 %v5396_v1, %v7044_v57 }
 0x205   :  { %v3604_v33 = vrot.slane %v3603_v59, 1  ;;  %v3614_v63 = vadd.f32 %v3613_v61, %v3612_v15  ;;  %v3541_v47 = vmax.f32 %v3509_v30, 0.0 }
 0x206   :  { %v3540_v5 = vmax.f32 %v3508_v18, 0.0 }
 0x207   :  { %v3605_v34 = vadd.f32 %v3604_v33, %v3603_v59  ;;  %v3616_v8 = vadd.f32 %v3615_v2, %v3614_v63  ;;  %v3619_v0 = vsel %vm3542_vm3, %v3541_v47, 0.0 }
 0x208   :  { %v3617_v37 = vsel %vm3542_vm3, %v3540_v5, 0.0 }
 0x209   :  { %v3630_v21 = vmul.f32 0.015625, %v3605_v34  ;;  %v3618_v22 = vadd.f32 %v3617_v37, %v3616_v8 }
 0x20b   :  { %v3640_v43 = vsel %vm3639_vm5, %v3630_v21, %v3638_v27  ;;  %v3620_v40 = vadd.f32 %v3619_v0, %v3618_v22  ;;  %v3803_v27 = vld [vmem:[%s7215_s3 + $0x20] sm:$0xff] }
 0x20c   :  { %v5358_v44 = vpack.c.bf16 %v3804_v24, %v3803_v27 }
 0x20d   :  { %v3621_v19 = vrot.slane %v3620_v40, 4 }
 0x20f   :  { %v3622_v51 = vadd.f32 %v3621_v19, %v3620_v40 }
 0x211   :  { %v3623_v57 = vrot.slane %v3622_v51, 2 }
 0x213   :  { %v3624_v54 = vadd.f32 %v3623_v57, %v3622_v51 }
 0x215   :  { %v3625_v58 = vrot.slane %v3624_v54, 1 }
 0x217   :  { %v3626_v23 = vadd.f32 %v3625_v58, %v3624_v54 }
 0x219   :  { %v3631_v62 = vmul.f32 0.015625, %v3626_v23  ;;  %v3782_v23 = vsub.s32 2, %v7027_v42 }
 0x21b   :  { %v3642_v3 = vsel %vm3641_vm6, %v3631_v62, %v3640_v43  ;;  %v3783_v62 = vrot.slane %v7039_v50, %v3782_v23 }
 0x21c   :  { %3646 = vst.msk [vmem:[#allocation2] sm:$0xf] %vm3645_vm7, %v3642_v3  ;;  %v3787_v3 = vsub.s32 3, %v7027_v42 }
 0x223   :  { %v3651_v6 = vld [vmem:[#allocation2] sm:$0xf] }
 0x224   :  { %5319 = vmatmul.mubr.msk.f32.vlgmr.msra.gmra.mrb[32].mxu1 %vm3542_vm3, %v3651_v6 }
 0x225   :  { %5337 = vmatprep.mubr.msk.f32.mxu1 %vm5650_vm2, %v5651_v11  ;;  %5353 = vmatpush3.bf16.msra.mxu1 %v5352_v12  ;;  %v3788_v12 = vrot.slane %v7039_v50, %v3787_v3 }
 0x226   :  { %5354 = vmatprep.subr.bf16.mxu1 %v5649_v60 }
 0x229   :  { %5356 = vmatpush3.bf16.msra.mxu1 %v5355_v20 }
 0x22a   :  { %5357 = vmatprep.subr.bf16.mxu1 %v5649_v60 }
 0x22d   :  { %5359 = vmatpush3.bf16.msra.mxu1 %v5358_v44 }
 0x22e   :  { %5360 = vmatprep.subr.bf16.mxu1 %v5649_v60 }
 0x231   :  { %5362 = vmatpush3.bf16.msra.mxu1 %v5361_v36 }
 0x232   :  { %5340 = vmatprep.subr.mxu1 %v5651_v11 }
 0x2f7   :  { %v3729_v46 = vpop.f32.mrb[32].mxu1 }
 0x2f8   :  { %v3730_v39 = vadd.f32 %v3729_v46, %v3659_v41  ;;  %v5320_v45 = vpop.f32.mrb[33].mxu1 }
 0x2fa   :  { %v3734_v29 = vsel %vm3733_vm8, %v3730_v39, 0.0  ;;  %v3744_v53 = vrot.slane %v3730_v39, 2 }
 0x2fb   :  { %v3735_v49 = vrot.slane %v3734_v29, 4 }
 0x2fc   :  { %v3746_v16 = vsel %vm3733_vm8, %v3744_v53, 0.0 }
 0x2fd   :  { %v3736_v4 = vadd.f32 %v3735_v49, %v3734_v29  ;;  %v3747_v60 = vrot.slane %v3746_v16, 4 }
 0x2ff   :  { %v3737_v31 = vrot.slane %v3736_v4, 2  ;;  %v3748_v56 = vadd.f32 %v3747_v60, %v3746_v16 }
 0x301   :  { %v3738_v7 = vadd.f32 %v3737_v31, %v3736_v4  ;;  %v3749_v9 = vrot.slane %v3748_v56, 2 }
 0x303   :  { %v3739_v13 = vrot.slane %v3738_v7, 1  ;;  %v3750_v26 = vadd.f32 %v3749_v9, %v3748_v56 }
 0x305   :  { %v3740_v55 = vadd.f32 %v3739_v13, %v3738_v7  ;;  %v3751_v48 = vrot.slane %v3750_v26, 1 }
 0x307   :  { %v3742_v35 = vmul.f32 0.5, %v3740_v55  ;;  %v3752_v52 = vadd.f32 %v3751_v48, %v3750_v26 }
 0x309   :  { %v3753_v1 = vmul.f32 0.5, %v3752_v52  ;;  %v3754_v59 = vsub.f32 %v3730_v39, %v3742_v35 }
 0x30b   :  { %v3755_v15 = vsub.f32 %v3730_v39, %v3753_v1  ;;  %v3756_v30 = vmul.f32 %v3754_v59, %v3754_v59 }
 0x30d   :  { %v3757_v61 = vsel %vm3733_vm8, %v3756_v30, 0.0  ;;  %v3765_v18 = vmul.f32 %v3755_v15, %v3755_v15 }
 0x30e   :  { %v3758_v33 = vrot.slane %v3757_v61, 4 }
 0x30f   :  { %v3767_v63 = vrot.slane %v3765_v18, 2 }
 0x310   :  { %v3759_v2 = vadd.f32 %v3758_v33, %v3757_v61 }
 0x311   :  { %v3769_v47 = vsel %vm3733_vm8, %v3767_v63, 0.0 }
 0x312   :  { %v3760_v5 = vrot.slane %v3759_v2, 2  ;;  %v3770_v34 = vrot.slane %v3769_v47, 4 }
 0x314   :  { %v3761_v8 = vadd.f32 %v3760_v5, %v3759_v2  ;;  %v3771_v37 = vadd.f32 %v3770_v34, %v3769_v47 }
 0x316   :  { %v3762_v21 = vrot.slane %v3761_v8, 1  ;;  %v3772_v22 = vrot.slane %v3771_v37, 2 }
 0x318   :  { %v3763_v0 = vadd.f32 %v3762_v21, %v3761_v8  ;;  %v3773_v43 = vadd.f32 %v3772_v22, %v3771_v37 }
 0x31a   :  { %v3764_v40 = vmul.f32 0.5, %v3763_v0  ;;  %v3774_v19 = vrot.slane %v3773_v43, 1 }
 0x31c   :  { %v3775_v51 = vadd.f32 %v3774_v19, %v3773_v43  ;;  %v3777_v57 = vadd.f32 1e-05, %v3764_v40 }
 0x31e   :  { %v3776_v54 = vmul.f32 0.5, %v3775_v51  ;;  %5627 = vrsqrt.f32 %v3777_v57 }
 0x320   :  { %v3791_v58 = vadd.f32 1e-05, %v3776_v54 }
 0x322   :  { %5629 = vrsqrt.f32 %v3791_v58 }
 0x328   :  { %v5628_v6 = vpop.eup %5627 }
 0x329   :  { %v3779_v25 = vmul.f32 %v5628_v6, %v3754_v59 }
 0x32b   :  { %v3784_v10 = vmul.f32 %v3783_v62, %v3779_v25 }
 0x32c   :  { %v5630_v17 = vpop.eup %5629 }
 0x32d   :  { %v3793_v14 = vmul.f32 %v5630_v17, %v3755_v15  ;;  %v3789_v27 = vadd.f32 %v3788_v12, %v3784_v10 }
 0x32f   :  { %v3794_v20 = vmul.f32 %v3793_v14, %v3783_v62  ;;  %v3790_v44 = vmax.f32 %v3789_v27, 0.0 }
 0x331   :  { %v3795_v24 = vadd.f32 %v3794_v20, %v3788_v12 }
 0x333   :  { %v3796_v28 = vmax.f32 %v3795_v24, 0.0 }
 0x335   :  { %v3798_v32 = vsel %vm3797_vm9, %v3790_v44, %v3796_v28 }
 0x336   :  { %5338 = vmatmul.mubr.msk.f32.vlgmr.msra.gmra.mrb[34].mxu1 %vm3807_vm10, %v3798_v32 }
 0x337   :  { %5342 = vmatprep.mubr.msk.f32.mxu1 %vm5650_vm2, %v5651_v11 }
 0x409   :  { %v3877_v42 = vpop.f32.mrb[34].mxu1 }
 0x40a   :  { %v5339_v36 = vpop.f32.mrb[35].mxu1  ;;  %v3881_v38 = vmul.f32 %v3877_v42, %v3877_v42 }
 0x40c   :  { %v3882_v41 = vsel %vm3645_vm7, %v3881_v38, 0.0 }
 0x40d   :  { %3883 = vadd.xlane.f32.xlu0 %v3882_v41 }
 0x49a   :  { %v3884_v50 = vpop.xlane.xlu0 %3883 }
 0x49b   :  { %v3885_v46 = vmax.f32 %v3884_v50, 1e-24 }
 0x49d   :  { %v3886_v39 = vmul.f32 0.5, %v3885_v46 }
 0x49f   :  { %5631 = vrsqrt.f32 %v3886_v39 }
 0x4a9   :  { %v5632_v45 = vpop.eup %5631 }
 0x4aa   :  { %v3888_v29 = vmul.f32 %v5632_v45, %v3877_v42 }
 0x4ac   :  { %5341 = vmatpush3.xpose.msk.msra.mxu1 %vm3542_vm3, %v3888_v29  ;;  %v3969_v53 = vrot.slane %v3888_v29, 2 }
 0x4ae   :  { %v3971_v49 = vmul.f32 %v3969_v53, %v3888_v29 }
 0x4af   :  { %5343 = vmatmul.mubr.msk.f32.vlgmr.msra.gmra.mrb[36].mxu1 %vm3542_vm3, %v3888_v29 }
 0x4b0   :  { %v3973_v11 = vsel %vm3972_vm11, %v3971_v49, 0.0 }
 0x4b1   :  { %3974 = vadd.xlane.f32.xlu1 %v3973_v11 }
 0x53e   :  { %v3975_v55 = vpop.xlane.xlu1 %3974 }
 0x53f   :  { %v3982_v35 = vmul.f32 2.0, %v3975_v55 }
 0x582   :  { %v3958_v16 = vpop.f32.mrb[36].mxu1 }
 0x583   :  { %v3962_v4 = vmul.f32 1.442695, %v3958_v16  ;;  %v5344_v60 = vpop.f32.mrb[37].mxu1 }
 0x585   :  { %5633 = vpow2.f32 %v3962_v4 }
 0x58f   :  { %v5634_v31 = vpop.eup %5633 }
 0x590   :  { %v3965_v56 = vsel %vm3964_vm12, %v5634_v31, 0.0 }
 0x591   :  { %3966 = vadd.xlane.f32.xlu0 %v3965_v56 }
 0x61e   :  { %v3967_v7 = vpop.xlane.xlu0 %3966 }
 0x61f   :  { %v4546_v9 = vadd.f32 -7.389056, %v3967_v7 }
 0x621   :  { %5635 = vlog2.f32 %v4546_v9 }
 0x62b   :  { %v5636_v13 = vpop.eup %5635 }
 0x62c   :  { %v3977_v26 = vmul.f32 0.6931472, %v5636_v13 }
 0x62e   :  { %v3979_v48 = vrot.slane %v3977_v26, 2 }
 0x630   :  { %v3981_v52 = vadd.f32 %v3979_v48, %v3977_v26 }
 0x632   :  { %v3983_v1 = vsub.f32 %v3981_v52, %v3982_v35 }
 0x634   :  { %v3985_v59 = vsel %vm3984_vm13, %v3983_v1, 0.0 }
 0x635   :  { %3986 = vadd.xlane.f32.xlu1 %v3985_v59 }
 0x6c2   :  { %v3987_v15 = vpop.xlane.xlu1 %3986 }
 0x6c3   :  { %v3988_v30 = vrot.slane %v3987_v15, 4 }
 0x6c5   :  { %v3989_v61 = vadd.f32 %v3988_v30, %v3987_v15 }
 0x6c7   :  { %v3990_v18 = vrot.slane %v3989_v61, 2 }
 0x6c9   :  { %v3991_v33 = vadd.f32 %v3990_v18, %v3989_v61 }
 0x6cb   :  { %v3992_v63 = vrot.slane %v3991_v33, 1 }
 0x6cd   :  { %v3993_v2 = vadd.f32 %v3992_v63, %v3991_v33 }
 0x6cf   :  { %5621 = vpush %v3993_v2 }
 0x700   :  { %s5622_s3 = spop %5621 }
 0x701   :  { %s3997_s9 = smul.f32 0.25, %s5622_s3 }
 0x703   :  { %3999 = sst [smem:[#allocation3]] %s3997_s9 }
 0x704   :  { %5646 = shalt.err (!%p5643_p2)
}
 0x705   :  { %s5652_s16 = smov [#allocation3]  }
 0x706   :  { %4007 = dma.smem_to_hbm %s5652_s16, 16, %s7217_s5, [#allocation4]  }
 0x707   :  { %5647 = dma.done.wait [#allocation4], 16  }
 0x708   :  { %5648 = vsyncadd [#allocation4], 4294967280 }
 0x709   :  { %4011 = sfence }
 0x70a   :  { %4012 = vsyncpa [#allocation4], 1 }

</bundles_post_ra>
